<compile_context>
chip_gen: v5e
topology: v5e:2x2
jax: 0.10.0
libtpu: 0.0.40
codegen_flags: <defaults>
</compile_context>

<pallas_src>
import functools
import math

import jax
import jax.numpy as jnp
from jax.experimental import pallas as pl
from jax.experimental.pallas import tpu as pltpu

_INV_SQRT2 = 1.0 / math.sqrt(2.0)


def _round_up(x, m):
    return ((x + m - 1) // m) * m


def residual_block_kernel(x_ref, w1_ref, b1_ref, g_ref, bt_ref, w2_ref, b2_ref,
                          o_ref, *, hidden, matmul_dtype):
    """One (TM, Hp) tile of tokens through Linear -> LN -> GELU -> (eval) Dropout -> Linear + skip."""
    x = x_ref[...]                                     # f32 tile (TM, Hp)

    # --- Linear 1 (MXU). Weights pre-transposed to (in, out); matmul inputs may be bf16, accum f32.
    h = jnp.dot(x.astype(matmul_dtype), w1_ref[...],
                preferred_element_type=jnp.float32) + b1_ref[...]

    # --- LayerNorm over the *true* hidden dim, fused single reduction pass (s1, s2).
    # Padded lanes of h are exactly zero (padded W cols / bias are zero), so lane sums are exact.
    inv_h = 1.0 / hidden
    s1 = jnp.sum(h, axis=-1, keepdims=True)
    s2 = jnp.sum(h * h, axis=-1, keepdims=True)
    mean = s1 * inv_h
    var = s2 * inv_h - mean * mean                     # biased variance, like torch.nn.LayerNorm
    hn = (h - mean) * jax.lax.rsqrt(var + 1e-5)
    hn = hn * g_ref[...] + bt_ref[...]                 # gamma/beta zero-padded -> padded lanes stay 0

    # --- GELU (exact erf form, matches torch.nn.GELU default), kept in f32.
    act = 0.5 * hn * (1.0 + jax.lax.erf(hn * _INV_SQRT2))

    # --- Dropout: identity (eval mode).
    # TODO(synk): training-mode dropout would use pltpu.prng_seed / pltpu.prng_random_bits for a mask.

    # --- Linear 2 (MXU) + residual (residual uses the original f32 x).
    y = jnp.dot(act.astype(matmul_dtype), w2_ref[...],
                preferred_element_type=jnp.float32) + b2_ref[...]
    o_ref[...] = (x + y).astype(o_ref.dtype)


def residual_block(x_tokens, w1, b1, gamma, beta, w2, b2, *,
                   tm=512, matmul_dtype=jnp.bfloat16):
    """x_tokens: (N, H) float32. w1/w2: (H, H) PyTorch layout (out, in). b/gamma/beta: (H,)."""
    N, H = x_tokens.shape
    H_pad = _round_up(H, 128)                          # lane-dense last dim (unmasked vst)
    tm_eff = min(tm, _round_up(max(N, 1), 128))        # 128-aligned token tile, no over-padding small N
    N_pad = _round_up(N, tm_eff)

    x_p = jnp.zeros((N_pad, H_pad), jnp.float32).at[:N, :H].set(
        x_tokens.astype(jnp.float32))

    def pad_mat(w):  # (out, in) torch layout -> transposed, zero-padded, matmul dtype
        wt = jnp.asarray(w, jnp.float32).T
        return jnp.zeros((H_pad, H_pad), matmul_dtype).at[:H, :H].set(
            wt.astype(matmul_dtype))

    def pad_vec(v):
        return jnp.zeros((1, H_pad), jnp.float32).at[0, :H].set(
            jnp.asarray(v, jnp.float32))

    w1_t, w2_t = pad_mat(w1), pad_mat(w2)
    b1_r, b2_r = pad_vec(b1), pad_vec(b2)
    g_r, bt_r = pad_vec(gamma), pad_vec(beta)

    # VMEM budget: resident weights + double-buffered x/out tiles (+margin), capped at 64 MiB (v7x).
    wbytes = jnp.dtype(matmul_dtype).itemsize
    est = (2 * 2 * H_pad * H_pad * wbytes              # two weight matrices (x2 buffering margin)
           + 4 * 2 * H_pad * 4                         # biases / gamma / beta
           + 2 * 2 * tm_eff * H_pad * 4)               # x + out tiles, double-buffered, f32
    vmem_limit = int(max(32 << 20, min(2 * est, 64 << 20)))

    full = lambda i: (0, 0)
    kernel = functools.partial(residual_block_kernel, hidden=H, matmul_dtype=matmul_dtype)

    out = pl.pallas_call(
        kernel,
        out_shape=jax.ShapeDtypeStruct((N_pad, H_pad), x_tokens.dtype),
        grid_spec=pltpu.PrefetchScalarGridSpec(
            num_scalar_prefetch=0,
            grid=(N_pad // tm_eff,),
            in_specs=[
                pl.BlockSpec((tm_eff, H_pad), lambda i: (i, 0)),  # x tile
                pl.BlockSpec((H_pad, H_pad), full),               # W1^T (resident)
                pl.BlockSpec((1, H_pad), full),                   # b1
                pl.BlockSpec((1, H_pad), full),                   # gamma
                pl.BlockSpec((1, H_pad), full),                   # beta
                pl.BlockSpec((H_pad, H_pad), full),               # W2^T (resident)
                pl.BlockSpec((1, H_pad), full),                   # b2
            ],
            out_specs=pl.BlockSpec((tm_eff, H_pad), lambda i: (i, 0)),
        ),
        compiler_params=pltpu.CompilerParams(
            dimension_semantics=("parallel",),         # token tiles shard across TCs on v7x
            vmem_limit_bytes=vmem_limit,
        ),
    )(x_p, w1_t, b1_r, g_r, bt_r, w2_t, b2_r)
    return out[:N, :H]


def residual_block_ref(x, w1, b1, gamma, beta, w2, b2):
    h = x @ w1.T + b1
    mean = h.mean(-1, keepdims=True)
    var = ((h - mean) ** 2).mean(-1, keepdims=True)
    hn = (h - mean) / jnp.sqrt(var + 1e-5) * gamma + beta
    act = 0.5 * hn * (1.0 + jax.lax.erf(hn / math.sqrt(2.0)))
    return x + (act @ w2.T + b2)


if __name__ == "__main__":
    B, S, H = 2, 8, 32  # batch=2, seq=8, hidden=32

    key = jax.random.PRNGKey(0)
    kx, kw1, kb1, kw2, kb2 = jax.random.split(key, 5)

    x = jax.random.normal(kx, (B, S, H), jnp.float32)

    # Deterministic parameter init (uniform like torch.nn.Linear default bound = 1/sqrt(H))
    bound = 1.0 / math.sqrt(H)
    w1 = jax.random.uniform(kw1, (H, H), jnp.float32, -bound, bound)
    b1 = jax.random.uniform(kb1, (H,), jnp.float32, -bound, bound)
    w2 = jax.random.uniform(kw2, (H, H), jnp.float32, -bound, bound)
    b2 = jax.random.uniform(kb2, (H,), jnp.float32, -bound, bound)
    gamma = jnp.ones((H,), jnp.float32)   # LayerNorm weight init
    beta = jnp.zeros((H,), jnp.float32)   # LayerNorm bias init

    x_tokens = x.reshape(B * S, H)
    ref = residual_block_ref(x, w1, b1, gamma, beta, w2, b2)

    # f32 matmul path (v5e-friendly config): tight tolerance.
    out_f32 = residual_block(x_tokens, w1, b1, gamma, beta, w2, b2,
                             matmul_dtype=jnp.float32).reshape(B, S, H)
    out_f32 = jax.block_until_ready(out_f32)
    err_f32 = float(jnp.max(jnp.abs(out_f32 - ref)))
    assert err_f32 < 2e-5, err_f32

    # bf16 matmul path (v6e/v7x performance config, f32 accumulation + f32 elementwise): loose tolerance.
    out_bf16 = residual_block(x_tokens, w1, b1, gamma, beta, w2, b2,
                              matmul_dtype=jnp.bfloat16).reshape(B, S, H)
    out_bf16 = jax.block_until_ready(out_bf16)
    err_bf16 = float(jnp.max(jnp.abs(out_bf16 - ref)))
    assert err_bf16 < 5e-2, err_bf16

    print("KERNEL_OK")
</pallas_src>

<mosaic_0001>
module attributes {stable_mosaic.version = 11 : i64} {
  func.func @residual_block_kernel(%arg0: i32, %arg1: memref<128x128xf32, #tpu.memory_space<vmem>>, %arg2: memref<128x128xf32, #tpu.memory_space<vmem>>, %arg3: memref<1x128xf32, #tpu.memory_space<vmem>>, %arg4: memref<1x128xf32, #tpu.memory_space<vmem>>, %arg5: memref<1x128xf32, #tpu.memory_space<vmem>>, %arg6: memref<128x128xf32, #tpu.memory_space<vmem>>, %arg7: memref<1x128xf32, #tpu.memory_space<vmem>>, %arg8: memref<128x128xf32, #tpu.memory_space<vmem>>) attributes {dimension_semantics = [#tpu.dimension_semantics<parallel>], iteration_bounds = array<i64: 1>, scalar_prefetch = 0 : i64, scratch_operands = 0 : i64, tpu.core_type = #tpu.core_type<tc>, window_params = [{transform_indices = @transform_0, window_bounds = array<i64: 128, 128>}, {pipeline_mode = #tpu.pipeline_mode<synchronous>, transform_indices = @transform_1, window_bounds = array<i64: 128, 128>}, {pipeline_mode = #tpu.pipeline_mode<synchronous>, transform_indices = @transform_2, window_bounds = array<i64: 1, 128>}, {pipeline_mode = #tpu.pipeline_mode<synchronous>, transform_indices = @transform_3, window_bounds = array<i64: 1, 128>}, {pipeline_mode = #tpu.pipeline_mode<synchronous>, transform_indices = @transform_4, window_bounds = array<i64: 1, 128>}, {pipeline_mode = #tpu.pipeline_mode<synchronous>, transform_indices = @transform_5, window_bounds = array<i64: 128, 128>}, {pipeline_mode = #tpu.pipeline_mode<synchronous>, transform_indices = @transform_6, window_bounds = array<i64: 1, 128>}, {transform_indices = @transform_7, window_bounds = array<i64: 128, 128>}]} {
    %c0 = arith.constant 0 : index
    %c0_0 = arith.constant 0 : index
    %0 = vector.load %arg1[%c0, %c0_0] : memref<128x128xf32, #tpu.memory_space<vmem>>, vector<128x128xf32>
    %c0_1 = arith.constant 0 : index
    %c0_2 = arith.constant 0 : index
    %1 = vector.load %arg2[%c0_1, %c0_2] : memref<128x128xf32, #tpu.memory_space<vmem>>, vector<128x128xf32>
    %cst = arith.constant dense<0.000000e+00> : vector<128x128xf32>
    %2 = tpu.matmul %0, %1, %cst {dimension_numbers = #tpu.dot_dimension_numbers<[1], [0], [0], [1], [0, 0, 1, 1], [], []>} : vector<128x128xf32>, vector<128x128xf32>, vector<128x128xf32> -> vector<128x128xf32>
    %c0_3 = arith.constant 0 : index
    %c0_4 = arith.constant 0 : index
    %3 = vector.load %arg3[%c0_3, %c0_4] : memref<1x128xf32, #tpu.memory_space<vmem>>, vector<1x128xf32>
    %4 = vector.broadcast %3 : vector<1x128xf32> to vector<128x128xf32>
    %5 = arith.addf %2, %4 : vector<128x128xf32>
    %cst_5 = arith.constant dense<0.000000e+00> : vector<128xf32>
    %6 = vector.multi_reduction <add>, %5, %cst_5 [1] : vector<128x128xf32> to vector<128xf32>
    %7 = vector.shape_cast %6 : vector<128xf32> to vector<128x1xf32>
    %8 = arith.mulf %5, %5 : vector<128x128xf32>
    %cst_6 = arith.constant dense<0.000000e+00> : vector<128xf32>
    %9 = vector.multi_reduction <add>, %8, %cst_6 [1] : vector<128x128xf32> to vector<128xf32>
    %10 = vector.shape_cast %9 : vector<128xf32> to vector<128x1xf32>
    %cst_7 = arith.constant 3.125000e-02 : f32
    %11 = vector.broadcast %cst_7 : f32 to vector<128x1xf32>
    %12 = arith.mulf %7, %11 : vector<128x1xf32>
    %cst_8 = arith.constant 3.125000e-02 : f32
    %13 = vector.broadcast %cst_8 : f32 to vector<128x1xf32>
    %14 = arith.mulf %10, %13 : vector<128x1xf32>
    %15 = arith.mulf %12, %12 : vector<128x1xf32>
    %16 = arith.subf %14, %15 : vector<128x1xf32>
    %17 = vector.broadcast %12 : vector<128x1xf32> to vector<128x128xf32>
    %18 = arith.subf %5, %17 : vector<128x128xf32>
    %cst_9 = arith.constant 9.99999974E-6 : f32
    %19 = vector.broadcast %cst_9 : f32 to vector<128x1xf32>
    %20 = arith.addf %16, %19 : vector<128x1xf32>
    %21 = math.rsqrt %20 : vector<128x1xf32>
    %22 = vector.broadcast %21 : vector<128x1xf32> to vector<128x128xf32>
    %23 = arith.mulf %18, %22 : vector<128x128xf32>
    %c0_10 = arith.constant 0 : index
    %c0_11 = arith.constant 0 : index
    %24 = vector.load %arg4[%c0_10, %c0_11] : memref<1x128xf32, #tpu.memory_space<vmem>>, vector<1x128xf32>
    %25 = vector.broadcast %24 : vector<1x128xf32> to vector<128x128xf32>
    %26 = arith.mulf %23, %25 : vector<128x128xf32>
    %c0_12 = arith.constant 0 : index
    %c0_13 = arith.constant 0 : index
    %27 = vector.load %arg5[%c0_12, %c0_13] : memref<1x128xf32, #tpu.memory_space<vmem>>, vector<1x128xf32>
    %28 = vector.broadcast %27 : vector<1x128xf32> to vector<128x128xf32>
    %29 = arith.addf %26, %28 : vector<128x128xf32>
    %cst_14 = arith.constant 5.000000e-01 : f32
    %30 = vector.broadcast %cst_14 : f32 to vector<128x128xf32>
    %31 = arith.mulf %30, %29 : vector<128x128xf32>
    %cst_15 = arith.constant 0.707106769 : f32
    %32 = vector.broadcast %cst_15 : f32 to vector<128x128xf32>
    %33 = arith.mulf %29, %32 : vector<128x128xf32>
    %34 = math.erf %33 : vector<128x128xf32>
    %cst_16 = arith.constant 1.000000e+00 : f32
    %35 = vector.broadcast %cst_16 : f32 to vector<128x128xf32>
    %36 = arith.addf %35, %34 : vector<128x128xf32>
    %37 = arith.mulf %31, %36 : vector<128x128xf32>
    %c0_17 = arith.constant 0 : index
    %c0_18 = arith.constant 0 : index
    %38 = vector.load %arg6[%c0_17, %c0_18] : memref<128x128xf32, #tpu.memory_space<vmem>>, vector<128x128xf32>
    %cst_19 = arith.constant dense<0.000000e+00> : vector<128x128xf32>
    %39 = tpu.matmul %37, %38, %cst_19 {dimension_numbers = #tpu.dot_dimension_numbers<[1], [0], [0], [1], [0, 0, 1, 1], [], []>} : vector<128x128xf32>, vector<128x128xf32>, vector<128x128xf32> -> vector<128x128xf32>
    %c0_20 = arith.constant 0 : index
    %c0_21 = arith.constant 0 : index
    %40 = vector.load %arg7[%c0_20, %c0_21] : memref<1x128xf32, #tpu.memory_space<vmem>>, vector<1x128xf32>
    %41 = vector.broadcast %40 : vector<1x128xf32> to vector<128x128xf32>
    %42 = arith.addf %39, %41 : vector<128x128xf32>
    %43 = arith.addf %0, %42 : vector<128x128xf32>
    %c0_22 = arith.constant 0 : index
    %c0_23 = arith.constant 0 : index
    %44 = vector.load %arg8[%c0_22, %c0_23] : memref<128x128xf32, #tpu.memory_space<vmem>>, vector<128x128xf32>
    tpu.vector_store %arg8[%c0_22, %c0_23], %43 {strides = array<i32>} : memref<128x128xf32, #tpu.memory_space<vmem>>, vector<128x128xf32>,
    return
  }
  func.func @transform_0(%arg0: i32) -> (i32, i32) {
    %c0_i32 = arith.constant 0 : i32
    %c0_i32_0 = arith.constant 0 : i32
    return %arg0, %c0_i32 : i32, i32
  }
  func.func @transform_1(%arg0: i32) -> (i32, i32) {
    %c0_i32 = arith.constant 0 : i32
    %c0_i32_0 = arith.constant 0 : i32
    %c0_i32_1 = arith.constant 0 : i32
    return %c0_i32, %c0_i32_0 : i32, i32
  }
  func.func @transform_2(%arg0: i32) -> (i32, i32) {
    %c0_i32 = arith.constant 0 : i32
    %c0_i32_0 = arith.constant 0 : i32
    %c0_i32_1 = arith.constant 0 : i32
    return %c0_i32, %c0_i32_0 : i32, i32
  }
  func.func @transform_3(%arg0: i32) -> (i32, i32) {
    %c0_i32 = arith.constant 0 : i32
    %c0_i32_0 = arith.constant 0 : i32
    %c0_i32_1 = arith.constant 0 : i32
    return %c0_i32, %c0_i32_0 : i32, i32
  }
  func.func @transform_4(%arg0: i32) -> (i32, i32) {
    %c0_i32 = arith.constant 0 : i32
    %c0_i32_0 = arith.constant 0 : i32
    %c0_i32_1 = arith.constant 0 : i32
    return %c0_i32, %c0_i32_0 : i32, i32
  }
  func.func @transform_5(%arg0: i32) -> (i32, i32) {
    %c0_i32 = arith.constant 0 : i32
    %c0_i32_0 = arith.constant 0 : i32
    %c0_i32_1 = arith.constant 0 : i32
    return %c0_i32, %c0_i32_0 : i32, i32
  }
  func.func @transform_6(%arg0: i32) -> (i32, i32) {
    %c0_i32 = arith.constant 0 : i32
    %c0_i32_0 = arith.constant 0 : i32
    %c0_i32_1 = arith.constant 0 : i32
    return %c0_i32, %c0_i32_0 : i32, i32
  }
  func.func @transform_7(%arg0: i32) -> (i32, i32) {
    %c0_i32 = arith.constant 0 : i32
    %c0_i32_0 = arith.constant 0 : i32
    return %arg0, %c0_i32 : i32, i32
  }
}

</mosaic_0001>

<bundles_post_ra>
// kernel: tpu_custom_call.1
= control target key start
LH: loop header
LB: loop body
LE: loop exit
PB: predicated region body
PF: predicated region fallthrough
CT: control target
= control target key end

     0   :  { %12 = vsyncpa [#allocation3], 0  ;;  %s2902_s0 = inlined_call_operand.hbm [shape: f32[128,128], index: 0, kind: input, shape index: {}]   ;;  %s2903_s1 = inlined_call_operand.hbm [shape: f32[128,128], index: 1, kind: input, shape index: {}]   ;;  %s2904_s2 = inlined_call_operand.vmem [shape: f32[1,128], index: 2, kind: input, shape index: {}]   ;;  %s2905_s3 = inlined_call_operand.vmem [shape: f32[1,128], index: 3, kind: input, shape index: {}]   ;;  %s2906_s4 = inlined_call_operand.vmem [shape: f32[1,128], index: 4, kind: input, shape index: {}]   ;;  %s2907_s5 = inlined_call_operand.hbm [shape: f32[128,128], index: 5, kind: input, shape index: {}]   ;;  %s2908_s6 = inlined_call_operand.vmem [shape: f32[1,128], index: 6, kind: input, shape index: {}]   ;;  %s2909_s7 = inlined_call_operand.hbm [shape: f32[128,128], index: 7, kind: output, shape index: {}]  }
   0x1   :  { %13 = vsyncpa [#allocation6], 0 }
   0x2   :  { %14 = vsyncpa [#allocation4], 0  ;;  %s32_s26 = sshll.u32 %s2903_s1, 4  ;;  %s1650_s27 = smov [#allocation5]   ;;  %s33_s26 = int_to_ptr.hbm [resolvable:$true] %s32_s26 }
   0x3   :  { %s34_s28 = sshll.u32 %s1650_s27, 4  ;;  %s19_s8 = sshll.u32 %s2902_s0, 4  ;;  %s35_s28 = int_to_ptr.vmem [resolvable:$true] %s34_s28  ;;  %s20_s8 = int_to_ptr.hbm [resolvable:$true] %s19_s8 }
   0x4   :  { %s1651_s9 = smov 128   ;;  %s1652_s10 = smov 8  }
   0x5   :  { %40 = dma.hbm_to_vmem [thread:$0]  %s33_s26, 2048, %s35_s28, [#allocation6], %s1651_s9, %s1651_s9, %s1652_s10  }
   0x6   :  { %s1653_s11 = smov [#allocation2]   ;;  %s51_s1 = sshll.u32 %s2907_s5, 4  ;;  %s52_s1 = int_to_ptr.hbm [resolvable:$true] %s51_s1 }
   0x7   :  { %s21_s12 = sshll.u32 %s1653_s11, 4  ;;  %s1654_s0 = smov [#allocation7]   ;;  %s22_s12 = int_to_ptr.vmem [resolvable:$true] %s21_s12 }
   0x8   :  { %27 = dma.hbm_to_vmem [thread:$0]  %s20_s8, 2048, %s22_s12, [#allocation3], %s1651_s9, %s1651_s9, %s1652_s10  }
   0x9   :  { %s53_s15 = sshll.u32 %s1654_s0, 4  ;;  %s54_s15 = int_to_ptr.vmem [resolvable:$true] %s53_s15 }
   0xa   :  { %59 = dma.hbm_to_vmem [thread:$0]  %s52_s1, 2048, %s54_s15, [#allocation6], %s1651_s9, %s1651_s9, %s1652_s10  }
   0xb   :  { %1644 = dma.done.wait [#allocation3], 2048  }
   0xc   :  { %1645 = vsyncadd [#allocation3], 4294965248 }
   0xd   :  { %1646 = dma.done.wait [#allocation6], 4096  }
   0xe   :  { %1647 = vsyncadd [#allocation6], 4294963200  ;;  %v105_v0 = vld [vmem:[#allocation5 + $0x78] sm:$0xff]  ;;  %v104_v1 = vld [vmem:[#allocation5 + $0x70] sm:$0xff]  ;;  %s1394_s27 = sshll.u32 %s2909_s7, 4  ;;  %s1395_s27 = int_to_ptr.hbm [resolvable:$true] %s1394_s27 }
   0xf   :  { %110 = vmatpush.msra.mxu0 %v105_v0  ;;  %1424 = vmatpush.msra.mxu2 %v105_v0  ;;  %v103_v2 = vld [vmem:[#allocation5 + $0x68] sm:$0xff]  ;;  %v102_v3 = vld [vmem:[#allocation5 + $0x60] sm:$0xff]  ;;  %v101_v4 = vld [vmem:[#allocation5 + $0x58] sm:$0xff] }
  0x10   :  { %v100_v5 = vld [vmem:[#allocation5 + $0x50] sm:$0xff]  ;;  %v99_v6 = vld [vmem:[#allocation5 + $0x48] sm:$0xff]  ;;  %v98_v7 = vld [vmem:[#allocation5 + $0x40] sm:$0xff] }
  0x11   :  { %111 = vmatpush.msra.mxu0 %v104_v1  ;;  %1425 = vmatpush.msra.mxu2 %v104_v1  ;;  %v97_v8 = vld [vmem:[#allocation5 + $0x38] sm:$0xff]  ;;  %v96_v9 = vld [vmem:[#allocation5 + $0x30] sm:$0xff]  ;;  %v95_v10 = vld [vmem:[#allocation5 + $0x28] sm:$0xff] }
  0x12   :  { %v94_v11 = vld [vmem:[#allocation5 + $0x20] sm:$0xff]  ;;  %v93_v12 = vld [vmem:[#allocation5 + $0x18] sm:$0xff]  ;;  %v92_v13 = vld [vmem:[#allocation5 + $0x10] sm:$0xff] }
  0x13   :  { %112 = vmatpush.msra.mxu0 %v103_v2  ;;  %1426 = vmatpush.msra.mxu2 %v103_v2  ;;  %v91_v14 = vld [vmem:[#allocation5 + $0x8] sm:$0xff]  ;;  %v90_v15 = vld [vmem:[#allocation5] sm:$0xff]  ;;  %v76_v20 = vld [vmem:[#allocation2 + $0x10] sm:$0xff] }
  0x14   :  { %v74_v16 = vld [vmem:[#allocation2] sm:$0xff]  ;;  %v75_v18 = vld [vmem:[#allocation2 + $0x8] sm:$0xff]  ;;  %v84_v21 = vld [vmem:[#allocation2 + $0x50] sm:$0xff] }
  0x15   :  { %113 = vmatpush.msra.mxu0 %v102_v3  ;;  %1427 = vmatpush.msra.mxu2 %v102_v3  ;;  %v82_v17 = vld [vmem:[#allocation2 + $0x40] sm:$0xff]  ;;  %v83_v19 = vld [vmem:[#allocation2 + $0x48] sm:$0xff]  ;;  %v77_v22 = vld [vmem:[#allocation2 + $0x18] sm:$0xff] }
  0x16   :  { %v85_v23 = vld [vmem:[#allocation2 + $0x58] sm:$0xff]  ;;  %v86_v24 = vld [vmem:[#allocation2 + $0x60] sm:$0xff]  ;;  %v87_v26 = vld [vmem:[#allocation2 + $0x68] sm:$0xff] }
  0x17   :  { %114 = vmatpush.msra.mxu0 %v101_v4  ;;  %1428 = vmatpush.msra.mxu2 %v101_v4  ;;  %v78_v25 = vld [vmem:[#allocation2 + $0x20] sm:$0xff]  ;;  %v79_v27 = vld [vmem:[#allocation2 + $0x28] sm:$0xff]  ;;  %v88_v28 = vld [vmem:[#allocation2 + $0x70] sm:$0xff] }
  0x18   :  { %v80_v29 = vld [vmem:[#allocation2 + $0x30] sm:$0xff]  ;;  %v89_v30 = vld [vmem:[#allocation2 + $0x78] sm:$0xff]  ;;  %v1717_v32 = vld [vmem:[%s2904_s2] ss:$0 sm:$0xff] }
  0x19   :  { %115 = vmatpush.msra.mxu0 %v100_v5  ;;  %1429 = vmatpush.msra.mxu2 %v100_v5  ;;  %v81_v31 = vld [vmem:[#allocation2 + $0x38] sm:$0xff] }
  0x1b   :  { %116 = vmatpush.msra.mxu0 %v99_v6  ;;  %1430 = vmatpush.msra.mxu2 %v99_v6 }
  0x1d   :  { %117 = vmatpush.msra.mxu0 %v98_v7  ;;  %1431 = vmatpush.msra.mxu2 %v98_v7 }
  0x1f   :  { %118 = vmatpush.msra.mxu0 %v97_v8  ;;  %1432 = vmatpush.msra.mxu2 %v97_v8 }
  0x21   :  { %119 = vmatpush.msra.mxu0 %v96_v9  ;;  %1433 = vmatpush.msra.mxu2 %v96_v9 }
  0x23   :  { %120 = vmatpush.msra.mxu0 %v95_v10  ;;  %1434 = vmatpush.msra.mxu2 %v95_v10 }
  0x25   :  { %121 = vmatpush.msra.mxu0 %v94_v11  ;;  %1435 = vmatpush.msra.mxu2 %v94_v11 }
  0x27   :  { %122 = vmatpush.msra.mxu0 %v93_v12  ;;  %1436 = vmatpush.msra.mxu2 %v93_v12 }
  0x29   :  { %123 = vmatpush.msra.mxu0 %v92_v13  ;;  %1437 = vmatpush.msra.mxu2 %v92_v13 }
  0x2b   :  { %124 = vmatpush.msra.mxu0 %v91_v14  ;;  %1438 = vmatpush.msra.mxu2 %v91_v14 }
  0x2d   :  { %125 = vmatpush.msra.mxu0 %v90_v15  ;;  %1439 = vmatpush.msra.mxu2 %v90_v15 }
  0x2e   :  { %126 = vmatmul.f32.vlgmr.msra.gmra.mxu0 %v74_v16  ;;  %150 = vmatmul.f32.vlgmr.msra.gmra.mxu2 %v82_v17 }
  0x36   :  { %129 = vmatmul.f32.gmra.mxu0 %v75_v18  ;;  %153 = vmatmul.f32.gmra.mxu2 %v83_v19 }
  0x3e   :  { %132 = vmatmul.f32.gmra.mxu0 %v76_v20  ;;  %156 = vmatmul.f32.gmra.mxu2 %v84_v21 }
  0x46   :  { %135 = vmatmul.f32.gmra.mxu0 %v77_v22  ;;  %159 = vmatmul.f32.gmra.mxu2 %v85_v23 }
  0x4e   :  { %162 = vmatmul.f32.gmra.mxu2 %v86_v24  ;;  %138 = vmatmul.f32.gmra.mxu0 %v78_v25 }
  0x56   :  { %165 = vmatmul.f32.gmra.mxu2 %v87_v26  ;;  %141 = vmatmul.f32.gmra.mxu0 %v79_v27 }
  0x5e   :  { %168 = vmatmul.f32.gmra.mxu2 %v88_v28  ;;  %144 = vmatmul.f32.gmra.mxu0 %v80_v29 }
  0x66   :  { %171 = vmatmul.f32.gmra.mxu2 %v89_v30  ;;  %147 = vmatmul.f32.gmra.mxu0 %v81_v31 }
  0xab   :  { %v127_v33 = vpop.f32.mrf.mxu0 }
  0xac   :  { %v1720_v34 = vadd.f32 %v1717_v32, %v127_v33 }
  0xae   :  { %175 = vadd.xlane.f32.xlu1 %v1720_v34  ;;  %v207_v35 = vmul.f32 %v1720_v34, %v1720_v34 }
  0xb0   :  { %223 = vadd.xlane.f32.xlu2 %v207_v35 }
  0xb1   :  { %v151_v36 = vpop.f32.mrf.mxu2 }
  0xb2   :  { %v1726_v37 = vadd.f32 %v1717_v32, %v151_v36 }
  0xb3   :  { %v130_v38 = vpop.f32.mrf.mxu0 }
  0xb4   :  { %v1729_v39 = vadd.f32 %v1717_v32, %v130_v38  ;;  %191 = vadd.xlane.f32.xlu0 %v1726_v37  ;;  %v215_v43 = vmul.f32 %v1726_v37, %v1726_v37 }
  0xb6   :  { %v208_v40 = vmul.f32 %v1729_v39, %v1729_v39 }
  0xb8   :  { %225 = vadd.xlane.f32.xlu2 %v208_v40 }
  0xb9   :  { %v154_v41 = vpop.f32.mrf.mxu2 }
  0xba   :  { %v1735_v42 = vadd.f32 %v1717_v32, %v154_v41 }
  0xbb   :  { %v133_v44 = vpop.f32.mrf.mxu0 }
  0xbc   :  { %239 = vadd.xlane.f32.xlu0 %v215_v43  ;;  %193 = vadd.xlane.f32.xlu1 %v1735_v42  ;;  %v216_v45 = vmul.f32 %v1735_v42, %v1735_v42  ;;  %v1743_v46 = vadd.f32 %v1717_v32, %v133_v44 }
  0xbe   :  { %v209_v52 = vmul.f32 %v1743_v46, %v1743_v46 }
  0xc0   :  { %241 = vadd.xlane.f32.xlu2 %v216_v45 }
  0xc1   :  { %v157_v47 = vpop.f32.mrf.mxu2 }
  0xc2   :  { %v1751_v50 = vadd.f32 %v1717_v32, %v157_v47  ;;  %v1286_v47 = vld [vmem:[#allocation7 + $0x78] sm:$0xff] }
  0xc3   :  { %v136_v48 = vpop.f32.mrf.mxu0  ;;  %1291 = vmatpush.msra.mxu1 %v1286_v47  ;;  %1440 = vmatpush.msra.mxu3 %v1286_v47 }
  0xc4   :  { %177 = vadd.xlane.f32.xlu0 %v1729_v39  ;;  %179 = vadd.xlane.f32.xlu1 %v1743_v46  ;;  %v1748_v49 = vadd.f32 %v1717_v32, %v136_v48  ;;  %v217_v57 = vmul.f32 %v1751_v50, %v1751_v50 }
  0xc6   :  { %2921 = vst [vmem:[#allocation12_spill] sm:$0xff] %v1748_v49  ;;  %v210_v58 = vmul.f32 %v1748_v49, %v1748_v49 }
  0xc8   :  { %181 = vadd.xlane.f32.xlu2 %v1748_v49 }
  0xc9   :  { %v160_v51 = vpop.f32.mrf.mxu2 }
  0xca   :  { %v1758_v53 = vadd.f32 %v1717_v32, %v160_v51 }
  0xcb   :  { %v139_v54 = vpop.f32.mrf.mxu0 }
  0xcc   :  { %227 = vadd.xlane.f32.xlu0 %v209_v52  ;;  %195 = vadd.xlane.f32.xlu1 %v1751_v50  ;;  %2922 = vst [vmem:[#allocation13_spill] sm:$0xff] %v1758_v53  ;;  %v1762_v55 = vadd.f32 %v1717_v32, %v139_v54  ;;  %v218_v62 = vmul.f32 %v1758_v53, %v1758_v53 }
  0xce   :  { %v211_v59 = vmul.f32 %v1762_v55, %v1762_v55 }
  0xd0   :  { %197 = vadd.xlane.f32.xlu2 %v1758_v53 }
  0xd1   :  { %v163_v56 = vpop.f32.mrf.mxu2 }
  0xd2   :  { %v1771_v60 = vadd.f32 %v1717_v32, %v163_v56  ;;  %v1285_v56 = vld [vmem:[#allocation7 + $0x70] sm:$0xff] }
  0xd3   :  { %v142_v0 = vpop.f32.mrf.mxu0  ;;  %1292 = vmatpush.msra.mxu1 %v1285_v56  ;;  %1441 = vmatpush.msra.mxu3 %v1285_v56 }
  0xd4   :  { %243 = vadd.xlane.f32.xlu0 %v217_v57  ;;  %229 = vadd.xlane.f32.xlu1 %v210_v58  ;;  %v219_v63 = vmul.f32 %v1771_v60, %v1771_v60  ;;  %v1779_v1 = vadd.f32 %v1717_v32, %v142_v0  ;;  %v1284_v0 = vld [vmem:[#allocation7 + $0x68] sm:$0xff] }
  0xd5   :  { %1293 = vmatpush.msra.mxu1 %v1284_v0  ;;  %1442 = vmatpush.msra.mxu3 %v1284_v0  ;;  %v1277_v0 = vld [vmem:[#allocation7 + $0x30] sm:$0xff] }
  0xd6   :  { %2923 = vst [vmem:[#allocation14_spill] sm:$0xff] %v1779_v1  ;;  %v212_v10 = vmul.f32 %v1779_v1, %v1779_v1 }
  0xd8   :  { %231 = vadd.xlane.f32.xlu2 %v211_v59 }
  0xd9   :  { %v166_v61 = vpop.f32.mrf.mxu2 }
  0xda   :  { %v1787_v4 = vadd.f32 %v1717_v32, %v166_v61 }
  0xdb   :  { %v145_v5 = vpop.f32.mrf.mxu0 }
  0xdc   :  { %183 = vadd.xlane.f32.xlu0 %v1762_v55  ;;  %245 = vadd.xlane.f32.xlu1 %v218_v62  ;;  %v220_v6 = vmul.f32 %v1787_v4, %v1787_v4  ;;  %v1794_v7 = vadd.f32 %v1717_v32, %v145_v5  ;;  %v1834_v62 = vld [vmem:[%s2905_s3] ss:$0 sm:$0xff] }
  0xde   :  { %v213_v14 = vmul.f32 %v1794_v7, %v1794_v7 }
  0xe0   :  { %247 = vadd.xlane.f32.xlu2 %v219_v63 }
  0xe1   :  { %v169_v2 = vpop.f32.mrf.mxu2 }
  0xe2   :  { %v1784_v3 = vadd.f32 %v1717_v32, %v169_v2 }
  0xe3   :  { %v148_v13 = vpop.f32.mrf.mxu0 }
  0xe4   :  { %199 = vadd.xlane.f32.xlu0 %v1771_v60  ;;  %185 = vadd.xlane.f32.xlu1 %v1779_v1  ;;  %2924 = vst [vmem:[#allocation15_spill] sm:$0xff] %v1784_v3  ;;  %v221_v11 = vmul.f32 %v1784_v3, %v1784_v3  ;;  %v1810_v15 = vadd.f32 %v1717_v32, %v148_v13 }
  0xe6   :  { %v214_v16 = vmul.f32 %v1810_v15, %v1810_v15 }
  0xe8   :  { %203 = vadd.xlane.f32.xlu2 %v1784_v3 }
  0xe9   :  { %v172_v8 = vpop.f32.mrf.mxu2 }
  0xea   :  { %v1798_v9 = vadd.f32 %v1717_v32, %v172_v8 }
  0xec   :  { %249 = vadd.xlane.f32.xlu0 %v220_v6  ;;  %201 = vadd.xlane.f32.xlu1 %v1787_v4  ;;  %v222_v12 = vmul.f32 %v1798_v9, %v1798_v9 }
  0xf0   :  { %187 = vadd.xlane.f32.xlu2 %v1794_v7 }
  0xf4   :  { %233 = vadd.xlane.f32.xlu0 %v212_v10  ;;  %251 = vadd.xlane.f32.xlu1 %v221_v11  ;;  %v1283_v10 = vld [vmem:[#allocation7 + $0x60] sm:$0xff] }
  0xf5   :  { %1294 = vmatpush.msra.mxu1 %v1283_v10  ;;  %1443 = vmatpush.msra.mxu3 %v1283_v10 }
  0xf8   :  { %253 = vadd.xlane.f32.xlu2 %v222_v12  ;;  %v1846_v12 = vld [vmem:[%s2906_s4] ss:$0 sm:$0xff] }
  0xfc   :  { %205 = vadd.xlane.f32.xlu0 %v1798_v9  ;;  %235 = vadd.xlane.f32.xlu1 %v213_v14  ;;  %v1282_v14 = vld [vmem:[#allocation7 + $0x58] sm:$0xff] }
  0xfd   :  { %1295 = vmatpush.msra.mxu1 %v1282_v14  ;;  %1444 = vmatpush.msra.mxu3 %v1282_v14  ;;  %v1276_v14 = vld [vmem:[#allocation7 + $0x28] sm:$0xff] }
 0x104   :  { %189 = vadd.xlane.f32.xlu0 %v1810_v15  ;;  %237 = vadd.xlane.f32.xlu1 %v214_v16 }
 0x121   :  { %v176_v17 = vpop.xlane.xlu1 %175 }
 0x122   :  { %v255_v18 = vmul.f32 0.03125, %v176_v17 }
 0x123   :  { %v224_v19 = vpop.xlane.xlu2 %223 }
 0x124   :  { %v287_v20 = vmul.f32 %v255_v18, %v255_v18  ;;  %v271_v21 = vmul.f32 0.03125, %v224_v19  ;;  %v319_v59 = vsub.f32 %v1720_v34, %v255_v18 }
 0x126   :  { %v303_v22 = vsub.f32 %v271_v21, %v287_v20 }
 0x127   :  { %v192_v23 = vpop.xlane.xlu0 %191 }
 0x128   :  { %v335_v24 = vadd.f32 1e-05, %v303_v22  ;;  %v1815_v26 = vmul.f32 0.03125, %v192_v23  ;;  %v1281_v22 = vld [vmem:[#allocation7 + $0x50] sm:$0xff] }
 0x129   :  { %1296 = vmatpush.msra.mxu1 %v1281_v22  ;;  %1445 = vmatpush.msra.mxu3 %v1281_v22 }
 0x12a   :  { %1466 = vrsqrt.f32 %v335_v24  ;;  %v295_v30 = vmul.f32 %v1815_v26, %v1815_v26  ;;  %vm357_vm0 = vweird.f32 %v335_v24 }
 0x12b   :  { %v226_v25 = vpop.xlane.xlu2 %225 }
 0x12c   :  { %v272_v61 = vmul.f32 0.03125, %v226_v25 }
 0x12f   :  { %v240_v27 = vpop.xlane.xlu0 %239  ;;  %v194_v28 = vpop.xlane.xlu1 %193 }
 0x130   :  { %v1467_v29 = vpop.eup %1466  ;;  %v279_v31 = vmul.f32 0.03125, %v240_v27  ;;  %v1819_v32 = vmul.f32 0.03125, %v194_v28  ;;  %v1280_v27 = vld [vmem:[#allocation7 + $0x48] sm:$0xff] }
 0x131   :  { %v352_v33 = vmul.f32 %v1467_v29, %v335_v24  ;;  %vm358_vm1 = vweird.f32 %v1467_v29  ;;  %1297 = vmatpush.msra.mxu1 %v1280_v27  ;;  %1446 = vmatpush.msra.mxu3 %v1280_v27 }
 0x132   :  { %v311_v35 = vsub.f32 %v279_v31, %v295_v30  ;;  %v296_v36 = vmul.f32 %v1819_v32, %v1819_v32  ;;  %vm359_vm2 = vmor %vm357_vm0, %vm358_vm1 }
 0x133   :  { %v353_v38 = vmul.f32 %v1467_v29, %v352_v33  ;;  %v242_v40 = vpop.xlane.xlu2 %241  ;;  %v1279_v33 = vld [vmem:[#allocation7 + $0x40] sm:$0xff] }
 0x134   :  { %v1823_v41 = vadd.f32 1e-05, %v311_v35  ;;  %v280_v43 = vmul.f32 0.03125, %v242_v40  ;;  %1298 = vmatpush.msra.mxu1 %v1279_v33  ;;  %1447 = vmatpush.msra.mxu3 %v1279_v33 }
 0x135   :  { %v354_v44 = vmul.f32 0.5, %v353_v38 }
 0x136   :  { %1468 = vrsqrt.f32 %v1823_v41  ;;  %v312_v45 = vsub.f32 %v280_v43, %v296_v36  ;;  %vm437_vm4 = vweird.f32 %v1823_v41 }
 0x137   :  { %v355_v48 = vsub.f32 1.5, %v354_v44  ;;  %v178_v51 = vpop.xlane.xlu0 %177  ;;  %v180_v52 = vpop.xlane.xlu1 %179 }
 0x138   :  { %v1826_v54 = vmul.f32 0.03125, %v178_v51  ;;  %v1828_v58 = vadd.f32 1e-05, %v312_v45  ;;  %v1852_v18 = vmul.f32 0.03125, %v180_v52  ;;  %v1278_v45 = vld [vmem:[#allocation7 + $0x38] sm:$0xff] }
 0x139   :  { %v356_v57 = vmul.f32 %v1467_v29, %v355_v48  ;;  %1299 = vmatpush.msra.mxu1 %v1278_v45  ;;  %1448 = vmatpush.msra.mxu3 %v1278_v45 }
 0x13a   :  { %v288_v63 = vmul.f32 %v1826_v54, %v1826_v54  ;;  %1470 = vrsqrt.f32 %v1828_v58  ;;  %v289_v23 = vmul.f32 %v1852_v18, %v1852_v18  ;;  %vm447_vm8 = vweird.f32 %v1828_v58 }
 0x13b   :  { %v182_v2 = vpop.xlane.xlu2 %181  ;;  %v360_v5 = vsel %vm359_vm2, %v1467_v29, %v356_v57  ;;  %1300 = vmatpush.msra.mxu1 %v1277_v0  ;;  %1449 = vmatpush.msra.mxu3 %v1277_v0 }
 0x13c   :  { %v1838_v6 = vpop.eup %1468  ;;  %v304_v8 = vsub.f32 %v272_v61, %v288_v63  ;;  %v511_v34 = vmul.f32 %v360_v5, %v319_v59  ;;  %v1871_v43 = vmul.f32 0.03125, %v182_v2 }
 0x13d   :  { %v432_v11 = vmul.f32 %v1838_v6, %v1823_v41  ;;  %vm438_vm3 = vweird.f32 %v1838_v6  ;;  %1301 = vmatpush.msra.mxu1 %v1276_v14  ;;  %1450 = vmatpush.msra.mxu3 %v1276_v14  ;;  %v1274_v41 = vld [vmem:[#allocation7 + $0x18] sm:$0xff] }
 0x13e   :  { %v1848_v13 = vadd.f32 1e-05, %v304_v8  ;;  %v531_v16 = vmul.f32 %v1834_v62, %v511_v34  ;;  %2925 = vst [vmem:[#allocation16_spill] sm:$0xff] %v1871_v43  ;;  %v290_v57 = vmul.f32 %v1871_v43, %v1871_v43  ;;  %vm1901_vm5 = vmor %vm437_vm4, %vm438_vm3 }
 0x13f   :  { %v433_v17 = vmul.f32 %v1838_v6, %v432_v11  ;;  %v228_v19 = vpop.xlane.xlu0 %227  ;;  %v196_v20 = vpop.xlane.xlu1 %195 }
 0x140   :  { %1472 = vrsqrt.f32 %v1848_v13  ;;  %v273_v21 = vmul.f32 0.03125, %v228_v19  ;;  %v1858_v24 = vadd.f32 %v1846_v12, %v531_v16  ;;  %v1860_v28 = vpop.eup %1470  ;;  %v1873_v44 = vmul.f32 0.03125, %v196_v20 }
 0x141   :  { %v434_v25 = vmul.f32 0.5, %v433_v17  ;;  %v442_v40 = vmul.f32 %v1860_v28, %v1828_v58  ;;  %vm448_vm6 = vweird.f32 %v1860_v28  ;;  %vm367_vm10 = vweird.f32 %v1848_v13 }
 0x142   :  { %v305_v29 = vsub.f32 %v273_v21, %v289_v23  ;;  %v1863_v31 = vmul.f32 0.70710677, %v1858_v24  ;;  %2926 = vst [vmem:[#allocation17_spill] sm:$0xff] %v1873_v44  ;;  %v297_v59 = vmul.f32 %v1873_v44, %v1873_v44  ;;  %v1275_v23 = vld [vmem:[#allocation7 + $0x20] sm:$0xff]  ;;  %vm1959_vm9 = vmor %vm447_vm8, %vm448_vm6 }
 0x143   :  { %v198_v30 = vpop.xlane.xlu2 %197  ;;  %v435_v38 = vsub.f32 1.5, %v434_v25  ;;  %v443_v10 = vmul.f32 %v1860_v28, %v442_v40  ;;  %v327_v25 = vsub.f32 %v1726_v37, %v1815_v26  ;;  %1302 = vmatpush.msra.mxu1 %v1275_v23  ;;  %1451 = vmatpush.msra.mxu3 %v1275_v23  ;;  %v1271_v23 = vld [vmem:[#allocation7] sm:$0xff] }
 0x144   :  { %v599_v35 = vmul.f32 %v1863_v31, %v1863_v31  ;;  %v1877_v48 = vadd.f32 1e-05, %v305_v29  ;;  %v1906_v33 = vmul.f32 0.03125, %v198_v30 }
 0x145   :  { %v436_v8 = vmul.f32 %v1838_v6, %v435_v38  ;;  %v444_v26 = vmul.f32 0.5, %v443_v10  ;;  %1303 = vmatpush.msra.mxu1 %v1274_v41  ;;  %1452 = vmatpush.msra.mxu3 %v1274_v41 }
 0x146   :  { %v1867_v36 = vpop.eup %1472  ;;  %v1879_v56 = vmin.f32 %v599_v35, 16.0  ;;  %1474 = vrsqrt.f32 %v1877_v48  ;;  %2929 = vst [vmem:[#allocation18_spill] sm:$0xff] %v1906_v33 }
 0x147   :  { %v362_v47 = vmul.f32 %v1867_v36, %v1848_v13  ;;  %v244_v51 = vpop.xlane.xlu0 %243  ;;  %v230_v52 = vpop.xlane.xlu1 %229  ;;  %v440_v37 = vsel %vm1901_vm5, %v1838_v6, %v436_v8  ;;  %v298_v6 = vmul.f32 %v1906_v33, %v1906_v33  ;;  %vm368_vm7 = vweird.f32 %v1867_v36 }
 0x148   :  { %v281_v61 = vmul.f32 0.03125, %v244_v51  ;;  %v274_v63 = vmul.f32 0.03125, %v230_v52  ;;  %v601_v2 = vmul.f32 2.1237322e-06, %v1879_v56  ;;  %v612_v5 = vmul.f32 3.8918573e-05, %v1879_v56  ;;  %vm1968_vm11 = vmor %vm367_vm10, %vm368_vm7 }
 0x149   :  { %v363_v16 = vmul.f32 %v1867_v36, %v362_v47  ;;  %v519_v0 = vmul.f32 %v440_v37, %v327_v25  ;;  %vm377_vm5 = vweird.f32 %v1877_v48 }
 0x14a   :  { %v313_v34 = vsub.f32 %v281_v61, %v297_v59  ;;  %v306_v11 = vsub.f32 %v274_v63, %v290_v57  ;;  %v602_v19 = vadd.f32 0.00028619796, %v601_v2  ;;  %v613_v20 = vadd.f32 0.001143296, %v612_v5  ;;  %v1273_v57 = vld [vmem:[#allocation7 + $0x10] sm:$0xff]  ;;  %v1272_v5 = vld [vmem:[#allocation7 + $0x8] sm:$0xff] }
 0x14b   :  { %v232_v17 = vpop.xlane.xlu2 %231  ;;  %v364_v38 = vmul.f32 0.5, %v363_v16  ;;  %1304 = vmatpush.msra.mxu1 %v1273_v57  ;;  %1453 = vmatpush.msra.mxu3 %v1273_v57  ;;  %v445_v16 = vsub.f32 1.5, %v444_v26  ;;  %v539_v25 = vmul.f32 %v1834_v62, %v519_v0 }
 0x14c   :  { %v1893_v21 = vadd.f32 1e-05, %v313_v34  ;;  %v1895_v22 = vadd.f32 1e-05, %v306_v11  ;;  %v603_v29 = vmul.f32 %v602_v19, %v1879_v56  ;;  %v614_v35 = vmul.f32 %v613_v20, %v1879_v56  ;;  %v1916_v61 = vpop.eup %1474 }
 0x14d   :  { %v275_v40 = vmul.f32 0.03125, %v232_v17  ;;  %1305 = vmatpush.msra.mxu1 %v1272_v5  ;;  %1454 = vmatpush.msra.mxu3 %v1272_v5  ;;  %v365_v17 = vsub.f32 1.5, %v364_v38  ;;  %v372_v19 = vmul.f32 %v1916_v61, %v1877_v48  ;;  %vm378_vm4 = vweird.f32 %v1916_v61 }
 0x14e   :  { %1476 = vrsqrt.f32 %v1893_v21  ;;  %v604_v51 = vadd.f32 0.0036580483, %v603_v29  ;;  %v615_v59 = vadd.f32 0.014752088, %v614_v35  ;;  %v328_v29 = vsub.f32 %v1735_v42, %v1819_v32 }
 0x14f   :  { %v184_v45 = vpop.xlane.xlu0 %183  ;;  %v246_v47 = vpop.xlane.xlu1 %245  ;;  %1478 = vrsqrt.f32 %v1895_v22  ;;  %1306 = vmatpush.msra.mxu1 %v1271_v23  ;;  %1455 = vmatpush.msra.mxu3 %v1271_v23  ;;  %v366_v42 = vmul.f32 %v1867_v36, %v365_v17  ;;  %v373_v32 = vmul.f32 %v1916_v61, %v372_v19 }
 0x150   :  { %v1914_v30 = vmul.f32 0.03125, %v184_v45  ;;  %v282_v52 = vmul.f32 0.03125, %v246_v47  ;;  %v605_v63 = vmul.f32 %v604_v51, %v1879_v56  ;;  %v616_v11 = vmul.f32 %v615_v59, %v1879_v56 }
 0x151   :  { %v446_v47 = vmul.f32 %v1860_v28, %v445_v16  ;;  %v559_v59 = vadd.f32 %v1846_v12, %v539_v25  ;;  %v374_v16 = vmul.f32 0.5, %v373_v32 }
 0x152   :  { %v291_v2 = vmul.f32 %v1914_v30, %v1914_v30  ;;  %v314_v8 = vsub.f32 %v282_v52, %v298_v6  ;;  %v606_v34 = vadd.f32 0.05243302, %v605_v63  ;;  %v617_v45 = vadd.f32 0.112945676, %v616_v11 }
 0x153   :  { %v248_v10 = vpop.xlane.xlu2 %247  ;;  %v320_v6 = vsub.f32 %v1729_v39, %v1826_v54  ;;  %v450_v13 = vsel %vm1959_vm9, %v1860_v28, %v446_v47  ;;  %v370_v11 = vsel %vm1968_vm11, %v1867_v36, %v366_v42  ;;  %v1981_v19 = vmul.f32 0.70710677, %v559_v59  ;;  %vm2210_vm11 = vmor %vm377_vm5, %vm378_vm4 }
 0x154   :  { %v1924_v14 = vpop.eup %1476  ;;  %v307_v20 = vsub.f32 %v275_v40, %v291_v2  ;;  %v1939_v37 = vadd.f32 1e-05, %v314_v8  ;;  %v607_v40 = vmul.f32 %v606_v34, %v1879_v56  ;;  %v618_v57 = vmul.f32 %v617_v45, %v1879_v56 }
 0x155   :  { %v1929_v27 = vpop.eup %1478  ;;  %v452_v35 = vmul.f32 %v1924_v14, %v1893_v21  ;;  %v283_v63 = vmul.f32 0.03125, %v248_v10  ;;  %v512_v32 = vmul.f32 %v370_v11, %v320_v6 }
 0x156   :  { %v1935_v41 = vadd.f32 1e-05, %v307_v20  ;;  %2930 = vst [vmem:[#allocation19_spill] sm:$0xff] %v1939_v37  ;;  %v382_v52 = vmul.f32 %v1929_v27, %v1895_v22  ;;  %v608_v8 = vadd.f32 0.18741608, %v607_v40 }
 0x157   :  { %v200_v26 = vpop.xlane.xlu0 %199  ;;  %v186_v38 = vpop.xlane.xlu1 %185  ;;  %v453_v5 = vmul.f32 %v1924_v14, %v452_v35  ;;  %v619_v34 = vadd.f32 0.4994258, %v618_v57  ;;  %v1990_v35 = vmul.f32 0.5, %v1858_v24  ;;  %v520_v57 = vmul.f32 %v450_v13, %v328_v29 }
 0x158   :  { %v1945_v51 = vmul.f32 0.03125, %v200_v26  ;;  %1480 = vrsqrt.f32 %v1935_v41  ;;  %v383_v17 = vmul.f32 %v1929_v27, %v382_v52  ;;  %v609_v47 = vmul.f32 %v608_v8, %v1879_v56 }
 0x159   :  { %1482 = vrsqrt.f32 %v1939_v37  ;;  %v454_v26 = vmul.f32 0.5, %v453_v5  ;;  %v620_v42 = vmul.f32 %v619_v34, %v1879_v56  ;;  %v919_v5 = vmul.f32 %v1981_v19, %v1981_v19 }
 0x15a   :  { %v299_v0 = vmul.f32 %v1945_v51, %v1945_v51  ;;  %v610_v13 = vadd.f32 1.1283791, %v609_v47  ;;  %v2017_v11 = vmul.f32 %v1834_v62, %v512_v32  ;;  %vm397_vm13 = vweird.f32 %v1935_v41 }
 0x15b   :  { %v204_v58 = vpop.xlane.xlu2 %203  ;;  %v2003_v2 = vadd.f32 1.0, %v620_v42  ;;  %v455_v29 = vsub.f32 1.5, %v454_v26 }
 0x15c   :  { %v315_v10 = vsub.f32 %v283_v63, %v299_v0  ;;  %v375_v63 = vsub.f32 1.5, %v374_v16  ;;  %v384_v0 = vmul.f32 0.5, %v383_v17  ;;  %v2026_v26 = vmul.f32 0.03125, %v204_v58 }
 0x15d   :  { %vm627_vm14 = vweird.f32 %v2003_v2  ;;  %v633_v43 = vand.u32 2147483648, %v2003_v2 }
 0x15e   :  { %v1987_v25 = vadd.f32 1e-05, %v315_v10  ;;  %v1992_v28 = vpop.eup %1480  ;;  %v2013_v10 = vmul.f32 0.03125, %v186_v38  ;;  %v385_v42 = vsub.f32 1.5, %v384_v0  ;;  %2937 = vst [vmem:[#allocation22_spill] sm:$0xff] %v2026_v26  ;;  %v2028_v38 = vmin.f32 %v919_v5, 16.0 }
 0x15f   :  { %v250_v40 = vpop.xlane.xlu0 %249  ;;  %v202_v45 = vpop.xlane.xlu1 %201  ;;  %v392_v56 = vmul.f32 %v1992_v28, %v1935_v41  ;;  %v301_v0 = vmul.f32 %v2026_v26, %v2026_v26  ;;  %vm398_vm12 = vweird.f32 %v1992_v28 }
 0x160   :  { %1484 = vrsqrt.f32 %v1987_v25  ;;  %v1999_v52 = vmul.f32 0.03125, %v202_v45  ;;  %v2001_v24 = vpop.eup %1482  ;;  %v284_v6 = vmul.f32 0.03125, %v250_v40  ;;  %2935 = vst [vmem:[#allocation20_spill] sm:$0xff] %v2013_v10  ;;  %v2021_v45 = vmul.f32 0.5, %v559_v59  ;;  %vm2115_vm2 = vmor %vm397_vm13, %vm398_vm12 }
 0x161   :  { %1486 = vrcp.f32 %v2003_v2  ;;  %v462_v16 = vmul.f32 %v2001_v24, %v1939_v37  ;;  %v2024_v40 = vmul.f32 %v1916_v61, %v375_v63  ;;  %v393_v36 = vmul.f32 %v1992_v28, %v392_v56 }
 0x162   :  { %v300_v39 = vmul.f32 %v1999_v52, %v1999_v52  ;;  %2936 = vst [vmem:[#allocation21_spill] sm:$0xff] %v2021_v45  ;;  %v2040_v63 = vmul.f32 %v1924_v14, %v455_v29  ;;  %v2047_v56 = vmul.f32 %v610_v13, %v1863_v31  ;;  %v2054_v29 = vmul.f32 %v1929_v27, %v385_v42 }
 0x163   :  { %v188_v34 = vpop.xlane.xlu2 %187  ;;  %v463_v20 = vmul.f32 %v2001_v24, %v462_v16  ;;  %v921_v32 = vmul.f32 2.1237322e-06, %v2028_v38  ;;  %v932_v8 = vmul.f32 3.8918573e-05, %v2028_v38  ;;  %v394_v31 = vmul.f32 0.5, %v393_v36 }
 0x164   :  { %v316_v17 = vsub.f32 %v284_v6, %v300_v39  ;;  %v292_v6 = vmul.f32 %v2013_v10, %v2013_v10  ;;  %2938 = vst [vmem:[#allocation23_spill] sm:$0xff] %v2054_v29  ;;  %v2068_v53 = vmul.f32 0.03125, %v188_v34  ;;  %v631_v34 = vand.u32 2147483647, %v2003_v2 }
 0x165   :  { %v933_v1 = vadd.f32 0.001143296, %v932_v8  ;;  %v2066_v33 = vmul.f32 0.5, %v463_v20  ;;  %v395_v8 = vsub.f32 1.5, %v394_v31  ;;  %vm477_vm0 = vweird.f32 %v1987_v25 }
 0x166   :  { %v2030_v47 = vpop.eup %1484  ;;  %v2037_v59 = vadd.f32 1e-05, %v316_v17  ;;  %v293_v20 = vmul.f32 %v2068_v53, %v2068_v53  ;;  %v332_v29 = vsub.f32 %v1787_v4, %v1999_v52  ;;  %vm632_vm3 = vcmp.eq.f32.partialorder %v631_v34, 8.507059e+37 }
 0x167   :  { %v234_v5 = vpop.xlane.xlu0 %233  ;;  %v252_v39 = vpop.xlane.xlu1 %251  ;;  %v472_v58 = vmul.f32 %v2030_v47, %v1987_v25  ;;  %v396_v49 = vmul.f32 %v1992_v28, %v395_v8  ;;  %vm478_vm6 = vweird.f32 %v2030_v47  ;;  %vm458_vm12 = vweird.f32 %v1924_v14 }
 0x168   :  { %1488 = vrsqrt.f32 %v2037_v59  ;;  %v276_v17 = vmul.f32 0.03125, %v234_v5  ;;  %v285_v23 = vmul.f32 0.03125, %v252_v39  ;;  %v2051_v54 = vpop.eup %1486  ;;  %v922_v39 = vadd.f32 0.00028619796, %v921_v32  ;;  %vm2164_vm8 = vmor %vm477_vm0, %vm478_vm6 }
 0x169   :  { %v623_v16 = vmul.f32 %v2051_v54, %v2003_v2  ;;  %vm628_vm15 = vweird.f32 %v2051_v54  ;;  %v400_v2 = vsel %vm2115_vm2, %v1992_v28, %v396_v49  ;;  %vm487_vm9 = vweird.f32 %v2037_v59 }
 0x16a   :  { %v308_v13 = vsub.f32 %v276_v17, %v292_v6  ;;  %v317_v10 = vsub.f32 %v285_v23, %v301_v0  ;;  %v473_v6 = vmul.f32 %v2030_v47, %v472_v58  ;;  %v540_v17 = vmul.f32 %v1834_v62, %v520_v57  ;;  %vm629_vm1 = vmor %vm627_vm14, %vm628_vm15 }
 0x16b   :  { %v254_v42 = vpop.xlane.xlu2 %253  ;;  %v624_v0 = vsub.f32 1.0, %v623_v16  ;;  %v923_v16 = vmul.f32 %v922_v39, %v2028_v38  ;;  %v934_v57 = vmul.f32 %v933_v1, %v2028_v38  ;;  %vm457_vm13 = vweird.f32 %v1893_v21 }
 0x16c   :  { %v2070_v36 = vadd.f32 1e-05, %v308_v13  ;;  %v2072_v23 = vadd.f32 1e-05, %v317_v10  ;;  %v286_v32 = vmul.f32 0.03125, %v254_v42  ;;  %v474_v3 = vmul.f32 0.5, %v473_v6  ;;  %vm2281_vm0 = vmor %vm457_vm13, %vm458_vm12 }
 0x16d   :  { %v625_v42 = vmul.f32 %v2051_v54, %v624_v0  ;;  %v560_v37 = vadd.f32 %v1846_v12, %v540_v17  ;;  %v924_v6 = vadd.f32 0.0036580483, %v923_v16  ;;  %vm388_vm14 = vweird.f32 %v1929_v27 }
 0x16e   :  { %v2077_v5 = vpop.eup %1488  ;;  %1490 = vrsqrt.f32 %v2070_v36  ;;  %vm387_vm15 = vweird.f32 %v1895_v22  ;;  %v460_v21 = vsel %vm2281_vm0, %v1924_v14, %v2040_v63  ;;  %v2952_v14 = vld [vmem:[#allocation17_spill] sm:$0xff] }
 0x16f   :  { %v482_v10 = vmul.f32 %v2077_v5, %v2037_v59  ;;  %v206_v58 = vpop.xlane.xlu0 %205  ;;  %v236_v13 = vpop.xlane.xlu1 %235  ;;  %1492 = vrsqrt.f32 %v2072_v23  ;;  %v626_v0 = vadd.f32 %v2051_v54, %v625_v42  ;;  %v2127_v41 = vmul.f32 0.70710677, %v560_v37  ;;  %vm2314_vm2 = vmor %vm387_vm15, %vm388_vm14 }
 0x170   :  { %v2088_v31 = vmul.f32 0.03125, %v206_v58  ;;  %v277_v26 = vmul.f32 0.03125, %v236_v13  ;;  %v935_v13 = vadd.f32 0.014752088, %v934_v57  ;;  %v2140_v42 = vadd.f32 %v1846_v12, %v2017_v11 }
 0x171   :  { %v483_v45 = vmul.f32 %v2077_v5, %v482_v10  ;;  %v465_v10 = vsub.f32 1.5, %v2066_v33  ;;  %v475_v33 = vsub.f32 1.5, %v474_v3  ;;  %v630_v17 = vsel %vm629_vm1, %v2051_v54, %v626_v0 }
 0x172   :  { %v302_v39 = vmul.f32 %v2088_v31, %v2088_v31  ;;  %v309_v1 = vsub.f32 %v277_v26, %v293_v20  ;;  %v634_v20 = vor.u32 1.1754944e-38, %v633_v43  ;;  %v925_v54 = vmul.f32 %v924_v6, %v2028_v38 }
 0x173   :  { %v484_v58 = vmul.f32 0.5, %v483_v45  ;;  %v936_v43 = vmul.f32 %v935_v13, %v2028_v38  ;;  %v2150_v6 = vmul.f32 %v2001_v24, %v465_v10  ;;  %vm488_vm7 = vweird.f32 %v2077_v5 }
 0x174   :  { %v2103_v44 = vadd.f32 1e-05, %v309_v1  ;;  %v318_v8 = vsub.f32 %v286_v32, %v302_v39  ;;  %v2109_v26 = vpop.eup %1490  ;;  %v635_v3 = vsel %vm632_vm3, %v634_v20, %v630_v17  ;;  %v2941_v39 = vsub.f32 %v1762_v55, %v1914_v30  ;;  %vm2180_vm10 = vmor %vm487_vm9, %vm488_vm7 }
 0x175   :  { %v2120_v32 = vpop.eup %1492  ;;  %v485_v16 = vsub.f32 1.5, %v484_v58  ;;  %v402_v34 = vmul.f32 %v2109_v26, %v2070_v36  ;;  %v636_v49 = vmul.f32 %v635_v3, %v2047_v56  ;;  %v476_v58 = vmul.f32 %v2030_v47, %v475_v33 }
 0x176   :  { %1494 = vrsqrt.f32 %v2103_v44  ;;  %v2129_v57 = vadd.f32 1e-05, %v318_v8  ;;  %v515_v1 = vmul.f32 %v400_v2, %v2941_v39  ;;  %v492_v0 = vmul.f32 %v2120_v32, %v2072_v23 }
 0x177   :  { %v190_v28 = vpop.xlane.xlu0 %189  ;;  %v486_v56 = vmul.f32 %v2077_v5, %v485_v16  ;;  %v1408_v11 = vclamps-f32 %v636_v49, 1.0  ;;  %v926_v8 = vadd.f32 0.05243302, %v925_v54  ;;  %v937_v55 = vadd.f32 0.112945676, %v936_v43  ;;  %v238_v2 = vpop.xlane.xlu1 %237 }
 0x178   :  { %1496 = vrsqrt.f32 %v2129_v57  ;;  %v2154_v13 = vmul.f32 0.03125, %v190_v28  ;;  %v959_v30 = vmul.f32 %v2127_v41, %v2127_v41  ;;  %v403_v17 = vmul.f32 %v2109_v26, %v402_v34 }
 0x179   :  { %v1239_v20 = vadd.f32 1.0, %v1408_v11  ;;  %v2173_v16 = vmul.f32 %v1834_v62, %v515_v1  ;;  %v480_v25 = vsel %vm2164_vm8, %v2030_v47, %v476_v58  ;;  %v493_v59 = vmul.f32 %v2120_v32, %v492_v0 }
 0x17a   :  { %v927_v54 = vmul.f32 %v926_v8, %v2028_v38  ;;  %v490_v43 = vsel %vm2180_vm10, %v2077_v5, %v486_v56  ;;  %v938_v49 = vmul.f32 %v937_v55, %v2028_v38  ;;  %v2191_v28 = vmul.f32 0.5, %v560_v37 }
 0x17b   :  { %v1255_v34 = vmul.f32 %v1239_v20, %v1990_v35  ;;  %v294_v1 = vmul.f32 %v2154_v13, %v2154_v13  ;;  %v278_v58 = vmul.f32 0.03125, %v238_v2  ;;  %v2199_v0 = vmin.f32 %v959_v30, 16.0 }
 0x17c   :  { %v2158_v45 = vpop.eup %1494  ;;  %v2946_v5 = vsub.f32 %v1771_v60, %v1945_v51  ;;  %v404_v35 = vmul.f32 0.5, %v403_v17  ;;  %v928_v11 = vadd.f32 0.18741608, %v927_v54  ;;  %v524_v60 = vmul.f32 %v490_v43, %v332_v29 }
 0x17d   :  { %v412_v39 = vmul.f32 %v2158_v45, %v2103_v44  ;;  %1307 = vmatmul.f32.vlgmr.msra.gmra.mxu1 %v1255_v34  ;;  %v494_v51 = vmul.f32 0.5, %v493_v59  ;;  %v939_v55 = vadd.f32 0.4994258, %v938_v49  ;;  %v961_v30 = vmul.f32 2.1237322e-06, %v2199_v0 }
 0x17e   :  { %v2193_v47 = vpop.eup %1496  ;;  %v523_v56 = vmul.f32 %v480_v25, %v2946_v5  ;;  %v972_v17 = vmul.f32 3.8918573e-05, %v2199_v0  ;;  %v2223_v48 = vmul.f32 0.70710677, %v2140_v42  ;;  %v380_v20 = vsel %vm2210_vm11, %v1916_v61, %v2024_v40 }
 0x17f   :  { %v502_v10 = vmul.f32 %v2193_v47, %v2129_v57  ;;  %v413_v4 = vmul.f32 %v2158_v45, %v412_v39  ;;  %v310_v52 = vsub.f32 %v278_v58, %v294_v1  ;;  %v940_v29 = vmul.f32 %v939_v55, %v2028_v38 }
 0x180   :  { %v962_v2 = vadd.f32 0.00028619796, %v961_v30  ;;  %v929_v25 = vmul.f32 %v928_v11, %v2028_v38  ;;  %v973_v3 = vadd.f32 0.001143296, %v972_v17  ;;  %v639_v59 = vmul.f32 %v2223_v48, %v2223_v48 }
 0x181   :  { %v2949_v54 = vsub.f32 %v1743_v46, %v1852_v18  ;;  %v2239_v61 = vmul.f32 %v1834_v62, %v523_v56  ;;  %v405_v40 = vsub.f32 1.5, %v404_v35  ;;  %v2241_v34 = vadd.f32 1.0, %v940_v29 }
 0x182   :  { %v963_v49 = vmul.f32 %v962_v2, %v2199_v0  ;;  %v495_v39 = vsub.f32 1.5, %v494_v51  ;;  %v503_v38 = vmul.f32 %v2193_v47, %v502_v10  ;;  %v974_v1 = vmul.f32 %v973_v3, %v2199_v0 }
 0x183   :  { %v513_v43 = vmul.f32 %v380_v20, %v2949_v54  ;;  %v2247_v58 = vmin.f32 %v639_v59, 16.0  ;;  %v2250_v46 = vmul.f32 %v1834_v62, %v524_v60  ;;  %v2254_v5 = vadd.f32 1e-05, %v310_v52 }
 0x184   :  { %1498 = vrcp.f32 %v2241_v34  ;;  %v2258_v56 = vmul.f32 0.5, %v413_v4  ;;  %v930_v35 = vadd.f32 1.1283791, %v929_v25  ;;  %v964_v11 = vadd.f32 0.0036580483, %v963_v49 }
 0x185   :  { %v533_v8 = vmul.f32 %v1834_v62, %v513_v43  ;;  %v2262_v51 = vmul.f32 %v2109_v26, %v405_v40  ;;  %v975_v60 = vadd.f32 0.014752088, %v974_v1  ;;  %v641_v55 = vmul.f32 2.1237322e-06, %v2247_v58 }
 0x186   :  { %v652_v30 = vmul.f32 3.8918573e-05, %v2247_v58  ;;  %v2267_v10 = vmul.f32 %v2120_v32, %v495_v39  ;;  %v2269_v17 = vmul.f32 0.5, %v503_v38  ;;  %v965_v20 = vmul.f32 %v964_v11, %v2199_v0 }
 0x187   :  { %v2273_v4 = vmul.f32 0.5, %v2140_v42  ;;  %1500 = vrsqrt.f32 %v2254_v5  ;;  %v976_v52 = vmul.f32 %v975_v60, %v2199_v0  ;;  %v642_v29 = vadd.f32 0.00028619796, %v641_v55 }
 0x188   :  { %v653_v2 = vadd.f32 0.001143296, %v652_v30  ;;  %v415_v3 = vsub.f32 1.5, %v2258_v56  ;;  %v931_v59 = vmul.f32 %v930_v35, %v1981_v19  ;;  %v966_v42 = vadd.f32 0.05243302, %v965_v20 }
 0x189   :  { %v2288_v54 = vadd.f32 %v1846_v12, %v533_v8  ;;  %v977_v40 = vadd.f32 0.112945676, %v976_v52  ;;  %v643_v49 = vmul.f32 %v642_v29, %v2247_v58  ;;  %v505_v38 = vsub.f32 1.5, %v2269_v17 }
 0x18a   :  { %v1499_v43 = vpop.eup %1498  ;;  %v654_v39 = vmul.f32 %v653_v2, %v2247_v58  ;;  %vm947_vm1 = vweird.f32 %v2241_v34  ;;  %v967_v19 = vmul.f32 %v966_v42, %v2199_v0  ;;  %v953_v56 = vand.u32 2147483648, %v2241_v34 }
 0x18b   :  { %v943_v1 = vmul.f32 %v1499_v43, %v2241_v34  ;;  %v978_v35 = vmul.f32 %v977_v40, %v2199_v0  ;;  %v644_v11 = vadd.f32 0.0036580483, %v643_v49  ;;  %v2303_v30 = vmul.f32 0.70710677, %v2288_v54  ;;  %v2956_v49 = vld [vmem:[#allocation23_spill] sm:$0xff] }
 0x18c   :  { %v655_v8 = vadd.f32 0.014752088, %v654_v39  ;;  %v968_v55 = vadd.f32 0.18741608, %v967_v19  ;;  %v2953_v63 = vsub.f32 %v1751_v50, %v2952_v14  ;;  %v951_v29 = vand.u32 2147483647, %v2241_v34 }
 0x18d   :  { %v944_v60 = vsub.f32 1.0, %v943_v1  ;;  %v2308_v20 = vpop.eup %1500  ;;  %v979_v2 = vadd.f32 0.4994258, %v978_v35  ;;  %v645_v25 = vmul.f32 %v644_v11, %v2247_v58  ;;  %vm468_vm3 = vweird.f32 %v2001_v24  ;;  %v2957_v35 = vld [vmem:[#allocation19_spill] sm:$0xff] }
 0x18e   :  { %v521_v17 = vmul.f32 %v460_v21, %v2953_v63  ;;  %v656_v42 = vmul.f32 %v655_v8, %v2247_v58  ;;  %vm948_vm4 = vweird.f32 %v1499_v43  ;;  %v679_v40 = vmul.f32 %v2303_v30, %v2303_v30 }
 0x18f   :  { %v945_v50 = vmul.f32 %v1499_v43, %v944_v60  ;;  %v390_v22 = vsel %vm2314_vm2, %v1929_v27, %v2956_v49  ;;  %v980_v39 = vmul.f32 %v979_v2, %v2199_v0  ;;  %v646_v21 = vadd.f32 0.05243302, %v645_v25  ;;  %vm949_vm6 = vmor %vm947_vm1, %vm948_vm4  ;;  %v2958_v2 = vld [vmem:[#allocation12_spill] sm:$0xff] }
 0x190   :  { %v657_v1 = vadd.f32 0.112945676, %v656_v42  ;;  %v541_v19 = vmul.f32 %v1834_v62, %v521_v17  ;;  %vm467_vm5 = vweird.f32 %v2957_v35  ;;  %v954_v8 = vor.u32 1.1754944e-38, %v953_v56  ;;  %v2959_v25 = vld [vmem:[#allocation16_spill] sm:$0xff] }
 0x191   :  { %v946_v11 = vadd.f32 %v1499_v43, %v945_v50  ;;  %v969_v60 = vmul.f32 %v968_v55, %v2199_v0  ;;  %v2332_v14 = vmin.f32 %v679_v40, 16.0  ;;  %v2336_v63 = vadd.f32 1.0, %v980_v39  ;;  %vm2376_vm8 = vmor %vm467_vm5, %vm468_vm3 }
 0x192   :  { %v647_v27 = vmul.f32 %v646_v21, %v2247_v58  ;;  %v658_v52 = vmul.f32 %v657_v1, %v2247_v58  ;;  %v2960_v17 = vsub.f32 %v2958_v2, %v2959_v25  ;;  %vm952_vm7 = vcmp.eq.f32.partialorder %v951_v29, 8.507059e+37 }
 0x193   :  { %v950_v49 = vsel %vm949_vm6, %v1499_v43, %v946_v11  ;;  %v681_v56 = vmul.f32 2.1237322e-06, %v2332_v14  ;;  %v692_v0 = vmul.f32 3.8918573e-05, %v2332_v14  ;;  %v422_v34 = vmul.f32 %v2308_v20, %v2254_v5 }
 0x194   :  { %v514_v42 = vmul.f32 %v390_v22, %v2960_v17  ;;  %v955_v55 = vsel %vm952_vm7, %v954_v8, %v950_v49  ;;  %1502 = vrcp.f32 %v2336_v63  ;;  %v2349_v50 = vadd.f32 %v1846_v12, %v541_v19 }
 0x195   :  { %v956_v40 = vmul.f32 %v955_v55, %v931_v59  ;;  %v970_v39 = vadd.f32 1.1283791, %v969_v60  ;;  %v648_v21 = vadd.f32 0.18741608, %v647_v27  ;;  %v659_v1 = vadd.f32 0.4994258, %v658_v52 }
 0x196   :  { %v2352_v43 = vmul.f32 %v2158_v45, %v415_v3  ;;  %v682_v29 = vadd.f32 0.00028619796, %v681_v56  ;;  %v693_v22 = vadd.f32 0.001143296, %v692_v0  ;;  %v534_v11 = vmul.f32 %v1834_v62, %v514_v42 }
 0x197   :  { %v2356_v2 = vmul.f32 %v2193_v47, %v505_v38  ;;  %v1416_v8 = vclamps-f32 %v956_v40, 1.0  ;;  %v991_v25 = vand.u32 2147483647, %v2336_v63  ;;  %v660_v19 = vmul.f32 %v659_v1, %v2247_v58 }
 0x198   :  { %v649_v59 = vmul.f32 %v648_v21, %v2247_v58  ;;  %v683_v60 = vmul.f32 %v682_v29, %v2332_v14  ;;  %v694_v27 = vmul.f32 %v693_v22, %v2332_v14  ;;  %v2364_v3 = vmul.f32 0.70710677, %v2349_v50 }
 0x199   :  { %v2367_v52 = vmul.f32 %v2308_v20, %v422_v34  ;;  %v1247_v17 = vadd.f32 1.0, %v1416_v8  ;;  %v971_v38 = vmul.f32 %v970_v39, %v2127_v41  ;;  %v2370_v42 = vadd.f32 1.0, %v660_v19  ;;  %v2963_v41 = vld [vmem:[#allocation21_spill] sm:$0xff]  ;;  %v2967_v19 = vld [vmem:[#allocation18_spill] sm:$0xff] }
 0x19a   :  { %v1503_v49 = vpop.eup %1502  ;;  %v684_v56 = vadd.f32 0.0036580483, %v683_v60  ;;  %v695_v0 = vadd.f32 0.014752088, %v694_v27  ;;  %v999_v34 = vmul.f32 %v2364_v3, %v2364_v3  ;;  %v2383_v55 = vadd.f32 %v1846_v12, %v534_v11 }
 0x19b   :  { %v1263_v40 = vmul.f32 %v1247_v17, %v2963_v41  ;;  %v983_v39 = vmul.f32 %v1503_v49, %v2336_v63  ;;  %vm987_vm9 = vweird.f32 %v2336_v63  ;;  %v470_v35 = vsel %vm2376_vm8, %v2001_v24, %v2150_v6 }
 0x19c   :  { %vm2392_vm10 = vcmp.eq.f32.partialorder %v991_v25, 8.507059e+37  ;;  %v993_v1 = vand.u32 2147483648, %v2336_v63  ;;  %v650_v29 = vadd.f32 1.1283791, %v649_v59  ;;  %1504 = vrcp.f32 %v2370_v42  ;;  %v2966_v25 = vld [vmem:[#allocation13_spill] sm:$0xff] }
 0x19d   :  { %1331 = vmatmul.f32.vlgmr.msra.gmra.mxu3 %v1263_v40  ;;  %v984_v12 = vsub.f32 1.0, %v983_v39  ;;  %v685_v22 = vmul.f32 %v684_v56, %v2332_v14  ;;  %v696_v11 = vmul.f32 %v695_v0, %v2332_v14  ;;  %v2400_v8 = vmin.f32 %v999_v34, 16.0 }
 0x19e   :  { %vm988_vm11 = vweird.f32 %v1503_v49  ;;  %v671_v24 = vand.u32 2147483647, %v2370_v42  ;;  %v2404_v6 = vmul.f32 0.70710677, %v2383_v55  ;;  %v2968_v60 = vsub.f32 %v2966_v25, %v2967_v19 }
 0x19f   :  { %v985_v27 = vmul.f32 %v1503_v49, %v984_v12  ;;  %v686_v17 = vadd.f32 0.05243302, %v685_v22  ;;  %v697_v58 = vadd.f32 0.112945676, %v696_v11  ;;  %v1001_v41 = vmul.f32 2.1237322e-06, %v2400_v8  ;;  %vm989_vm12 = vmor %vm987_vm9, %vm988_vm11 }
 0x1a0   :  { %v522_v59 = vmul.f32 %v470_v35, %v2968_v60  ;;  %v994_v56 = vor.u32 1.1754944e-38, %v993_v1  ;;  %v651_v0 = vmul.f32 %v650_v29, %v2223_v48  ;;  %v1012_v34 = vmul.f32 3.8918573e-05, %v2400_v8 }
 0x1a1   :  { %v719_v40 = vmul.f32 %v2404_v6, %v2404_v6  ;;  %v986_v39 = vadd.f32 %v1503_v49, %v985_v27  ;;  %v687_v18 = vmul.f32 %v686_v17, %v2332_v14  ;;  %v698_v37 = vmul.f32 %v697_v58, %v2332_v14 }
 0x1a2   :  { %v1002_v25 = vadd.f32 0.00028619796, %v1001_v41  ;;  %v1505_v35 = vpop.eup %1504  ;;  %vm667_vm13 = vweird.f32 %v2370_v42  ;;  %v673_v48 = vand.u32 2147483648, %v2370_v42  ;;  %v1013_v1 = vadd.f32 0.001143296, %v1012_v34 }
 0x1a3   :  { %v2421_v29 = vmin.f32 %v719_v40, 16.0  ;;  %v990_v12 = vsel %vm989_vm12, %v1503_v49, %v986_v39  ;;  %v663_v22 = vmul.f32 %v1505_v35, %v2370_v42  ;;  %vm2424_vm14 = vcmp.eq.f32.partialorder %v671_v24, 8.507059e+37 }
 0x1a4   :  { %v542_v19 = vmul.f32 %v1834_v62, %v522_v59  ;;  %v995_v63 = vsel %vm2392_vm10, %v994_v56, %v990_v12  ;;  %v699_v60 = vadd.f32 0.4994258, %v698_v37  ;;  %v1003_v27 = vmul.f32 %v1002_v25, %v2400_v8 }
 0x1a5   :  { %v1014_v17 = vmul.f32 %v1013_v1, %v2400_v8  ;;  %v996_v58 = vmul.f32 %v995_v63, %v971_v38  ;;  %v664_v41 = vsub.f32 1.0, %v663_v22  ;;  %v688_v34 = vadd.f32 0.18741608, %v687_v18 }
 0x1a6   :  { %v721_v49 = vmul.f32 2.1237322e-06, %v2421_v29  ;;  %v700_v24 = vmul.f32 %v699_v60, %v2332_v14  ;;  %v1004_v40 = vadd.f32 0.0036580483, %v1003_v27  ;;  %v732_v33 = vmul.f32 3.8918573e-05, %v2421_v29 }
 0x1a7   :  { %v1015_v39 = vadd.f32 0.014752088, %v1014_v17  ;;  %v1417_v62 = vclamps-f32 %v996_v58, 1.0  ;;  %v665_v59 = vmul.f32 %v1505_v35, %v664_v41  ;;  %vm668_vm15 = vweird.f32 %v1505_v35 }
 0x1a8   :  { %v722_v21 = vadd.f32 0.00028619796, %v721_v49  ;;  %v674_v37 = vor.u32 1.1754944e-38, %v673_v48  ;;  %v2436_v56 = vadd.f32 1.0, %v700_v24  ;;  %v1005_v25 = vmul.f32 %v1004_v40, %v2400_v8  ;;  %vm669_vm0 = vmor %vm667_vm13, %vm668_vm15  ;;  %v2448_v48 = vld [vmem:[%s2906_s4] ss:$0 sm:$0xff] }
 0x1a9   :  { %v1016_v38 = vmul.f32 %v1015_v39, %v2400_v8  ;;  %v1248_v18 = vadd.f32 1.0, %v1417_v62  ;;  %v666_v1 = vadd.f32 %v1505_v35, %v665_v59  ;;  %v733_v22 = vadd.f32 0.001143296, %v732_v33 }
 0x1aa   :  { %v723_v12 = vmul.f32 %v722_v21, %v2421_v29  ;;  %v689_v63 = vmul.f32 %v688_v34, %v2332_v14  ;;  %1506 = vrcp.f32 %v2436_v56  ;;  %v562_v60 = vadd.f32 %v2448_v48, %v542_v19 }
 0x1ab   :  { %v2453_v27 = vadd.f32 %v2448_v48, %v2173_v16  ;;  %v1264_v33 = vmul.f32 %v1248_v18, %v2191_v28  ;;  %v670_v17 = vsel %vm669_vm0, %v1505_v35, %v666_v1  ;;  %v1006_v42 = vadd.f32 0.05243302, %v1005_v25 }
 0x1ac   :  { %v1017_v58 = vadd.f32 0.112945676, %v1016_v38  ;;  %v2457_v14 = vmul.f32 0.5, %v2367_v52  ;;  %v675_v41 = vsel %vm2424_vm14, %v674_v37, %v670_v17  ;;  %v2462_v34 = vmul.f32 0.5, %v2288_v54 }
 0x1ad   :  { %v724_v49 = vadd.f32 0.0036580483, %v723_v12  ;;  %1334 = vmatmul.f32.gmra.mxu3 %v1264_v33  ;;  %v676_v19 = vmul.f32 %v675_v41, %v651_v0  ;;  %v1007_v16 = vmul.f32 %v1006_v42, %v2400_v8  ;;  %v734_v28 = vmul.f32 %v733_v22, %v2421_v29 }
 0x1ae   :  { %v1018_v24 = vmul.f32 %v1017_v58, %v2400_v8  ;;  %v690_v35 = vadd.f32 1.1283791, %v689_v63  ;;  %v2468_v52 = vmul.f32 0.70710677, %v562_v60  ;;  %v2471_v11 = vmul.f32 0.70710677, %v2453_v27 }
 0x1af   :  { %v725_v40 = vmul.f32 %v724_v49, %v2421_v29  ;;  %v1409_v39 = vclamps-f32 %v676_v19, 1.0  ;;  %v2474_v54 = vmul.f32 0.5, %v2349_v50  ;;  %v1008_v62 = vadd.f32 0.18741608, %v1007_v16 }
 0x1b0   :  { %v1019_v0 = vadd.f32 0.4994258, %v1018_v24  ;;  %v1507_v59 = vpop.eup %1506  ;;  %v2477_v21 = vmul.f32 0.5, %v2383_v55  ;;  %v735_v37 = vadd.f32 0.014752088, %v734_v28  ;;  %v1039_v25 = vmul.f32 %v2468_v52, %v2468_v52 }
 0x1b1   :  { %v759_v38 = vmul.f32 %v2471_v11, %v2471_v11  ;;  %v1240_v18 = vadd.f32 1.0, %v1409_v39  ;;  %v703_v1 = vmul.f32 %v1507_v59, %v2436_v56  ;;  %v711_v12 = vand.u32 2147483647, %v2436_v56 }
 0x1b2   :  { %v726_v50 = vadd.f32 0.05243302, %v725_v40  ;;  %v713_v22 = vand.u32 2147483648, %v2436_v56  ;;  %v1020_v63 = vmul.f32 %v1019_v0, %v2400_v8  ;;  %v736_v55 = vmul.f32 %v735_v37, %v2421_v29 }
 0x1b3   :  { %v2488_v33 = vmin.f32 %v1039_v25, 16.0  ;;  %v1256_v17 = vmul.f32 %v1240_v18, %v2273_v4  ;;  %v691_v42 = vmul.f32 %v690_v35, %v2303_v30  ;;  %v704_v58 = vsub.f32 1.0, %v703_v1 }
 0x1b4   :  { %v1009_v41 = vmul.f32 %v1008_v62, %v2400_v8  ;;  %vm708_vm1 = vweird.f32 %v1507_v59  ;;  %v2493_v49 = vadd.f32 1.0, %v1020_v63  ;;  %v737_v19 = vadd.f32 0.112945676, %v736_v55 }
 0x1b5   :  { %v2495_v16 = vmin.f32 %v759_v38, 16.0  ;;  %1310 = vmatmul.f32.gmra.mxu1 %v1256_v17  ;;  %v705_v24 = vmul.f32 %v1507_v59, %v704_v58  ;;  %v727_v28 = vmul.f32 %v726_v50, %v2421_v29  ;;  %v1041_v40 = vmul.f32 2.1237322e-06, %v2488_v33 }
 0x1b6   :  { %v1052_v39 = vmul.f32 3.8918573e-05, %v2488_v33  ;;  %vm707_vm2 = vweird.f32 %v2436_v56  ;;  %vm2501_vm3 = vcmp.eq.f32.partialorder %v711_v12, 8.507059e+37  ;;  %v714_v30 = vor.u32 1.1754944e-38, %v713_v22 }
 0x1b7   :  { %1508 = vrcp.f32 %v2493_v49  ;;  %v706_v8 = vadd.f32 %v1507_v59, %v705_v24  ;;  %v1010_v35 = vadd.f32 1.1283791, %v1009_v41  ;;  %v738_v62 = vmul.f32 %v737_v19, %v2421_v29  ;;  %vm709_vm4 = vmor %vm707_vm2, %vm708_vm1 }
 0x1b8   :  { %v1042_v0 = vadd.f32 0.00028619796, %v1041_v40  ;;  %v2508_v37 = vmul.f32 0.5, %v562_v60  ;;  %v1053_v25 = vadd.f32 0.001143296, %v1052_v39  ;;  %v2513_v56 = vadd.f32 %v2448_v48, %v2239_v61 }
 0x1b9   :  { %v761_v38 = vmul.f32 2.1237322e-06, %v2495_v16  ;;  %v710_v18 = vsel %vm709_vm4, %v1507_v59, %v706_v8  ;;  %v728_v1 = vadd.f32 0.18741608, %v727_v28  ;;  %v739_v12 = vadd.f32 0.4994258, %v738_v62 }
 0x1ba   :  { %v1043_v50 = vmul.f32 %v1042_v0, %v2488_v33  ;;  %v715_v22 = vsel %vm2501_vm3, %v714_v30, %v710_v18  ;;  %v1054_v63 = vmul.f32 %v1053_v25, %v2488_v33  ;;  %v772_v60 = vmul.f32 3.8918573e-05, %v2495_v16 }
 0x1bb   :  { %v762_v55 = vadd.f32 0.00028619796, %v761_v38  ;;  %v716_v17 = vmul.f32 %v715_v22, %v691_v42  ;;  %v1011_v58 = vmul.f32 %v1010_v35, %v2364_v3  ;;  %v740_v41 = vmul.f32 %v739_v12, %v2421_v29 }
 0x1bc   :  { %v1044_v61 = vadd.f32 0.0036580483, %v1043_v50  ;;  %v1031_v59 = vand.u32 2147483647, %v2493_v49  ;;  %v1055_v24 = vadd.f32 0.014752088, %v1054_v63  ;;  %v729_v30 = vmul.f32 %v728_v1, %v2421_v29 }
 0x1bd   :  { %v1509_v19 = vpop.eup %1508  ;;  %v763_v28 = vmul.f32 %v762_v55, %v2495_v16  ;;  %v773_v40 = vadd.f32 0.001143296, %v772_v60  ;;  %v1410_v39 = vclamps-f32 %v716_v17, 1.0  ;;  %v2526_v8 = vadd.f32 1.0, %v740_v41 }
 0x1be   :  { %v1023_v4 = vmul.f32 %v1509_v19, %v2493_v49  ;;  %v1045_v42 = vmul.f32 %v1044_v61, %v2488_v33  ;;  %v1056_v3 = vmul.f32 %v1055_v24, %v2488_v33  ;;  %v2533_v38 = vmul.f32 0.70710677, %v2513_v56 }
 0x1bf   :  { %v764_v35 = vadd.f32 0.0036580483, %v763_v28  ;;  %v774_v62 = vmul.f32 %v773_v40, %v2495_v16  ;;  %v1241_v0 = vadd.f32 1.0, %v1410_v39  ;;  %1510 = vrcp.f32 %v2526_v8 }
 0x1c0   :  { %v1024_v25 = vsub.f32 1.0, %v1023_v4  ;;  %vm1028_vm5 = vweird.f32 %v1509_v19  ;;  %v1033_v18 = vand.u32 2147483648, %v2493_v49  ;;  %v1046_v29 = vadd.f32 0.05243302, %v1045_v42 }
 0x1c1   :  { %v765_v1 = vmul.f32 %v764_v35, %v2495_v16  ;;  %v1257_v12 = vmul.f32 %v1241_v0, %v2462_v34  ;;  %v1057_v22 = vadd.f32 0.112945676, %v1056_v3  ;;  %v775_v63 = vadd.f32 0.014752088, %v774_v62 }
 0x1c2   :  { %v1025_v50 = vmul.f32 %v1509_v19, %v1024_v25  ;;  %vm1027_vm6 = vweird.f32 %v2493_v49  ;;  %v730_v55 = vadd.f32 1.1283791, %v729_v30  ;;  %v1047_v60 = vmul.f32 %v1046_v29, %v2488_v33 }
 0x1c3   :  { %v766_v17 = vadd.f32 0.05243302, %v765_v1  ;;  %1313 = vmatmul.f32.gmra.mxu1 %v1257_v12  ;;  %v1058_v61 = vmul.f32 %v1057_v22, %v2488_v33  ;;  %v776_v24 = vmul.f32 %v775_v63, %v2495_v16  ;;  %v1079_v28 = vmul.f32 %v2533_v38, %v2533_v38  ;;  %vm1029_vm8 = vmor %vm1027_vm6, %vm1028_vm5 }
 0x1c4   :  { %v1026_v41 = vadd.f32 %v1509_v19, %v1025_v50  ;;  %vm408_vm7 = vweird.f32 %v2109_v26  ;;  %vm1032_vm9 = vcmp.eq.f32.partialorder %v1031_v59, 8.507059e+37  ;;  %v1034_v34 = vor.u32 1.1754944e-38, %v1033_v18 }
 0x1c5   :  { %v1048_v49 = vadd.f32 0.18741608, %v1047_v60  ;;  %v767_v40 = vmul.f32 %v766_v17, %v2495_v16  ;;  %v1511_v39 = vpop.eup %1510  ;;  %v1059_v30 = vadd.f32 0.4994258, %v1058_v61  ;;  %v777_v42 = vadd.f32 0.112945676, %v776_v24 }
 0x1c6   :  { %v1030_v4 = vsel %vm1029_vm8, %v1509_v19, %v1026_v41  ;;  %v2547_v3 = vmin.f32 %v1079_v28, 16.0  ;;  %vm407_vm10 = vweird.f32 %v2070_v36  ;;  %v731_v62 = vmul.f32 %v730_v55, %v2404_v6  ;;  %v2981_v61 = vld [vmem:[#allocation14_spill] sm:$0xff] }
 0x1c7   :  { %v1035_v35 = vsel %vm1032_vm9, %v1034_v34, %v1030_v4  ;;  %v743_v0 = vmul.f32 %v1511_v39, %v2526_v8  ;;  %vm747_vm11 = vweird.f32 %v2526_v8  ;;  %v751_v25 = vand.u32 2147483647, %v2526_v8  ;;  %vm2587_vm1 = vmor %vm407_vm10, %vm408_vm7 }
 0x1c8   :  { %v1036_v59 = vmul.f32 %v1035_v35, %v1011_v58  ;;  %v1060_v18 = vmul.f32 %v1059_v30, %v2488_v33  ;;  %v778_v19 = vmul.f32 %v777_v42, %v2495_v16  ;;  %vm498_vm12 = vweird.f32 %v2120_v32 }
 0x1c9   :  { %v744_v29 = vsub.f32 1.0, %v743_v0  ;;  %v753_v1 = vand.u32 2147483648, %v2526_v8  ;;  %v1049_v12 = vmul.f32 %v1048_v49, %v2488_v33  ;;  %v1081_v6 = vmul.f32 2.1237322e-06, %v2547_v3 }
 0x1ca   :  { %v1418_v50 = vclamps-f32 %v1036_v59, 1.0  ;;  %v2560_v22 = vadd.f32 1.0, %v1060_v18  ;;  %v768_v63 = vadd.f32 0.18741608, %v767_v40  ;;  %v779_v58 = vadd.f32 0.4994258, %v778_v19 }
 0x1cb   :  { %vm497_vm13 = vweird.f32 %v2072_v23  ;;  %v745_v55 = vmul.f32 %v1511_v39, %v744_v29  ;;  %vm748_vm14 = vweird.f32 %v1511_v39  ;;  %v1082_v60 = vadd.f32 0.00028619796, %v1081_v6 }
 0x1cc   :  { %v1092_v17 = vmul.f32 3.8918573e-05, %v2547_v3  ;;  %v1249_v41 = vadd.f32 1.0, %v1418_v50  ;;  %vm2564_vm15 = vcmp.eq.f32.partialorder %v751_v25, 8.507059e+37  ;;  %1512 = vrcp.f32 %v2560_v22  ;;  %vm749_vm0 = vmor %vm747_vm11, %vm748_vm14 }
 0x1cd   :  { %v2571_v33 = vadd.f32 %v2448_v48, %v2250_v46  ;;  %v746_v24 = vadd.f32 %v1511_v39, %v745_v55  ;;  %v754_v28 = vor.u32 1.1754944e-38, %v753_v1  ;;  %v1050_v34 = vadd.f32 1.1283791, %v1049_v12  ;;  %vm2616_vm4 = vmor %vm497_vm13, %vm498_vm12 }
 0x1ce   :  { %v780_v49 = vmul.f32 %v779_v58, %v2495_v16  ;;  %v1265_v40 = vmul.f32 %v1249_v41, %v2474_v54  ;;  %v769_v4 = vmul.f32 %v768_v63, %v2495_v16  ;;  %v1083_v30 = vmul.f32 %v1082_v60, %v2547_v3 }
 0x1cf   :  { %v1093_v42 = vadd.f32 0.001143296, %v1092_v17  ;;  %v750_v35 = vsel %vm749_vm0, %v1511_v39, %v746_v24  ;;  %v1071_v0 = vand.u32 2147483647, %v2560_v22  ;;  %v1073_v46 = vand.u32 2147483648, %v2560_v22  ;;  %v2982_v24 = vld [vmem:[#allocation20_spill] sm:$0xff] }
 0x1d0   :  { %v2581_v59 = vadd.f32 1.0, %v780_v49  ;;  %1337 = vmatmul.f32.gmra.mxu3 %v1265_v40  ;;  %v755_v16 = vsel %vm2564_vm15, %v754_v28, %v750_v35  ;;  %v1084_v8 = vadd.f32 0.0036580483, %v1083_v30  ;;  %v2595_v25 = vmul.f32 0.70710677, %v2571_v33 }
 0x1d1   :  { %v1094_v39 = vmul.f32 %v1093_v42, %v2547_v3  ;;  %v756_v18 = vmul.f32 %v755_v16, %v731_v62  ;;  %v1051_v19 = vmul.f32 %v1050_v34, %v2468_v52  ;;  %v410_v36 = vsel %vm2587_vm1, %v2109_v26, %v2262_v51  ;;  %v2984_v16 = vld [vmem:[#allocation15_spill] sm:$0xff] }
 0x1d2   :  { %1514 = vrcp.f32 %v2581_v59  ;;  %v1513_v29 = vpop.eup %1512  ;;  %vm1067_vm2 = vweird.f32 %v2560_v22  ;;  %v1085_v1 = vmul.f32 %v1084_v8, %v2547_v3  ;;  %v1119_v6 = vmul.f32 %v2595_v25, %v2595_v25  ;;  %v2985_v8 = vld [vmem:[#allocation22_spill] sm:$0xff] }
 0x1d3   :  { %v1095_v12 = vadd.f32 0.014752088, %v1094_v39  ;;  %v1411_v50 = vclamps-f32 %v756_v18, 1.0  ;;  %v1063_v62 = vmul.f32 %v1513_v29, %v2560_v22  ;;  %vm2608_vm3 = vcmp.eq.f32.partialorder %v1071_v0, 8.507059e+37  ;;  %v2638_v0 = vld [vmem:[%s2905_s3] ss:$0 sm:$0xff] }
 0x1d4   :  { %v770_v63 = vadd.f32 1.1283791, %v769_v4  ;;  %v1074_v51 = vor.u32 1.1754944e-38, %v1073_v46  ;;  %v1086_v58 = vadd.f32 0.05243302, %v1085_v1  ;;  %v2621_v60 = vmin.f32 %v1119_v6, 16.0 }
 0x1d5   :  { %v1096_v55 = vmul.f32 %v1095_v12, %v2547_v3  ;;  %v1242_v17 = vadd.f32 1.0, %v1411_v50  ;;  %v1064_v41 = vsub.f32 1.0, %v1063_v62  ;;  %v2983_v28 = vsub.f32 %v2981_v61, %v2982_v24 }
 0x1d6   :  { %v500_v23 = vsel %vm2616_vm4, %v2120_v32, %v2267_v10  ;;  %vm508_vm5 = vweird.f32 %v2193_v47  ;;  %vm787_vm6 = vweird.f32 %v2581_v59  ;;  %v1121_v40 = vmul.f32 2.1237322e-06, %v2621_v60 }
 0x1d7   :  { %v516_v34 = vmul.f32 %v410_v36, %v2983_v28  ;;  %v1097_v49 = vadd.f32 0.112945676, %v1096_v55  ;;  %v1132_v4 = vmul.f32 3.8918573e-05, %v2621_v60  ;;  %v1258_v42 = vmul.f32 %v1242_v17, %v2477_v21 }
 0x1d8   :  { %v1515_v30 = vpop.eup %1514  ;;  %v1065_v35 = vmul.f32 %v1513_v29, %v1064_v41  ;;  %vm1068_vm7 = vweird.f32 %v1513_v29  ;;  %vm507_vm8 = vweird.f32 %v2129_v57  ;;  %v791_v46 = vand.u32 2147483647, %v2581_v59 }
 0x1d9   :  { %v536_v32 = vmul.f32 %v2638_v0, %v516_v34  ;;  %v783_v10 = vmul.f32 %v1515_v30, %v2581_v59  ;;  %v1098_v54 = vmul.f32 %v1097_v49, %v2547_v3  ;;  %v2986_v21 = vsub.f32 %v2984_v16, %v2985_v8  ;;  %1316 = vmatmul.f32.gmra.mxu1 %v1258_v42  ;;  %vm1069_vm10 = vmor %vm1067_vm2, %vm1068_vm7 }
 0x1da   :  { %vm418_vm9 = vweird.f32 %v2158_v45  ;;  %v1066_v18 = vadd.f32 %v1513_v29, %v1065_v35  ;;  %v1122_v36 = vadd.f32 0.00028619796, %v1121_v40  ;;  %v1133_v1 = vadd.f32 0.001143296, %v1132_v4  ;;  %vm2681_vm15 = vmor %vm507_vm8, %vm508_vm5 }
 0x1db   :  { %v525_v39 = vmul.f32 %v500_v23, %v2986_v21  ;;  %v2650_v12 = vadd.f32 %v2448_v48, %v536_v32  ;;  %v784_v6 = vsub.f32 1.0, %v783_v10  ;;  %v793_v50 = vand.u32 2147483648, %v2581_v59 }
 0x1dc   :  { %v1087_v62 = vmul.f32 %v1086_v58, %v2547_v3  ;;  %v1099_v26 = vadd.f32 0.4994258, %v1098_v54  ;;  %vm417_vm11 = vweird.f32 %v2103_v44  ;;  %v1070_v55 = vsel %vm1069_vm10, %v1513_v29, %v1066_v18 }
 0x1dd   :  { %vm788_vm12 = vweird.f32 %v1515_v30  ;;  %v1123_v17 = vmul.f32 %v1122_v36, %v2621_v60  ;;  %v1134_v41 = vmul.f32 %v1133_v1, %v2621_v60  ;;  %v1075_v61 = vsel %vm2608_vm3, %v1074_v51, %v1070_v55  ;;  %vm419_vm0 = vmor %vm417_vm11, %vm418_vm9 }
 0x1de   :  { %v785_v24 = vmul.f32 %v1515_v30, %v784_v6  ;;  %v1100_v22 = vmul.f32 %v1099_v26, %v2547_v3  ;;  %v545_v28 = vmul.f32 %v2638_v0, %v525_v39  ;;  %v1076_v34 = vmul.f32 %v1075_v61, %v1051_v19  ;;  %vm789_vm13 = vmor %vm787_vm6, %vm788_vm12 }
 0x1df   :  { %v1124_v23 = vadd.f32 0.0036580483, %v1123_v17  ;;  %v1135_v58 = vadd.f32 0.014752088, %v1134_v41  ;;  %v2664_v49 = vmul.f32 0.70710677, %v2650_v12  ;;  %v771_v32 = vmul.f32 %v770_v63, %v2471_v11 }
 0x1e0   :  { %v786_v29 = vadd.f32 %v1515_v30, %v785_v24  ;;  %v794_v40 = vor.u32 1.1754944e-38, %v793_v50  ;;  %v1088_v4 = vadd.f32 0.18741608, %v1087_v62  ;;  %v2666_v42 = vadd.f32 1.0, %v1100_v22 }
 0x1e1   :  { %v1419_v35 = vclamps-f32 %v1076_v34, 1.0  ;;  %v1125_v52 = vmul.f32 %v1124_v23, %v2621_v60  ;;  %v1136_v51 = vmul.f32 %v1135_v58, %v2621_v60  ;;  %v799_v19 = vmul.f32 %v2664_v49, %v2664_v49 }
 0x1e2   :  { %v790_v10 = vsel %vm789_vm13, %v1515_v30, %v786_v29  ;;  %vm792_vm14 = vcmp.eq.f32.partialorder %v791_v46, 8.507059e+37  ;;  %1516 = vrcp.f32 %v2666_v42  ;;  %v2686_v21 = vadd.f32 %v2448_v48, %v545_v28 }
 0x1e3   :  { %v1250_v54 = vadd.f32 1.0, %v1419_v35  ;;  %v795_v16 = vsel %vm792_vm14, %v794_v40, %v790_v10  ;;  %v1126_v8 = vadd.f32 0.05243302, %v1125_v52  ;;  %v510_v11 = vsel %vm2681_vm15, %v2193_v47, %v2356_v2 }
 0x1e4   :  { %v796_v63 = vmul.f32 %v795_v16, %v771_v32  ;;  %v1137_v30 = vadd.f32 0.112945676, %v1136_v51  ;;  %v2692_v46 = vmin.f32 %v799_v19, 16.0  ;;  %v425_v57 = vsub.f32 1.5, %v2457_v14 }
 0x1e5   :  { %v1266_v39 = vmul.f32 %v1250_v54, %v2508_v37  ;;  %v571_v18 = vmul.f32 0.5, %v2453_v27  ;;  %v1089_v36 = vmul.f32 %v1088_v4, %v2547_v3  ;;  %v2706_v50 = vmul.f32 0.5, %v2513_v56 }
 0x1e6   :  { %v1412_v1 = vclamps-f32 %v796_v63, 1.0  ;;  %v1138_v47 = vmul.f32 %v1137_v30, %v2621_v60  ;;  %v801_v2 = vmul.f32 2.1237322e-06, %v2692_v46  ;;  %v812_v6 = vmul.f32 3.8918573e-05, %v2692_v46 }
 0x1e7   :  { %1340 = vmatmul.f32.gmra.mxu3 %v1266_v39  ;;  %v1127_v27 = vmul.f32 %v1126_v8, %v2621_v60  ;;  %v2710_v37 = vmul.f32 0.70710677, %v2686_v21  ;;  %v420_v44 = vsel %vm419_vm0, %v2158_v45, %v2352_v43  ;;  %v2989_v17 = vsub.f32 %v1794_v7, %v2068_v53 }
 0x1e8   :  { %v1517_v3 = vpop.eup %1516  ;;  %v1243_v62 = vadd.f32 1.0, %v1412_v1  ;;  %v1139_v26 = vadd.f32 0.4994258, %v1138_v47  ;;  %v802_v55 = vadd.f32 0.00028619796, %v801_v2  ;;  %v2990_v22 = vsub.f32 %v1798_v9, %v2088_v31 }
 0x1e9   :  { %v517_v41 = vmul.f32 %v420_v44, %v2989_v17  ;;  %v1090_v61 = vadd.f32 1.1283791, %v1089_v36  ;;  %v1103_v56 = vmul.f32 %v1517_v3, %v2666_v42  ;;  %v813_v24 = vadd.f32 0.001143296, %v812_v6 }
 0x1ea   :  { %v526_v28 = vmul.f32 %v510_v11, %v2990_v22  ;;  %v1259_v34 = vmul.f32 %v1243_v62, %v571_v18  ;;  %v1140_v23 = vmul.f32 %v1139_v26, %v2621_v60  ;;  %v803_v45 = vmul.f32 %v802_v55, %v2692_v46 }
 0x1eb   :  { %v1159_v43 = vmul.f32 %v2710_v37, %v2710_v37  ;;  %v1104_v58 = vsub.f32 1.0, %v1103_v56  ;;  %v1113_v53 = vand.u32 2147483648, %v2666_v42  ;;  %v814_v7 = vmul.f32 %v813_v24, %v2692_v46 }
 0x1ec   :  { %v537_v29 = vmul.f32 %v2638_v0, %v517_v41  ;;  %1319 = vmatmul.f32.gmra.mxu1 %v1259_v34  ;;  %v1128_v40 = vadd.f32 0.18741608, %v1127_v27  ;;  %v2728_v4 = vadd.f32 1.0, %v1140_v23  ;;  %v804_v9 = vadd.f32 0.0036580483, %v803_v45 }
 0x1ed   :  { %v2730_v31 = vmin.f32 %v1159_v43, 16.0  ;;  %v1105_v35 = vmul.f32 %v1517_v3, %v1104_v58  ;;  %vm1108_vm1 = vweird.f32 %v1517_v3  ;;  %v1111_v52 = vand.u32 2147483647, %v2666_v42 }
 0x1ee   :  { %v815_v51 = vadd.f32 0.014752088, %v814_v7  ;;  %vm428_vm2 = vweird.f32 %v2308_v20  ;;  %vm1107_vm3 = vweird.f32 %v2666_v42  ;;  %1518 = vrcp.f32 %v2728_v4 }
 0x1ef   :  { %v2737_v19 = vadd.f32 %v2448_v48, %v537_v29  ;;  %v546_v32 = vmul.f32 %v2638_v0, %v526_v28  ;;  %v1106_v10 = vadd.f32 %v1517_v3, %v1105_v35  ;;  %v805_v59 = vmul.f32 %v804_v9, %v2692_v46  ;;  %vm1109_vm5 = vmor %vm1107_vm3, %vm1108_vm1 }
 0x1f0   :  { %v816_v54 = vmul.f32 %v815_v51, %v2692_v46  ;;  %v1161_v16 = vmul.f32 2.1237322e-06, %v2730_v31  ;;  %vm427_vm4 = vweird.f32 %v2254_v5  ;;  %v1091_v8 = vmul.f32 %v1090_v61, %v2533_v38 }
 0x1f1   :  { %v1114_v42 = vor.u32 1.1754944e-38, %v1113_v53  ;;  %v1129_v11 = vmul.f32 %v1128_v40, %v2621_v60  ;;  %v1172_v63 = vmul.f32 3.8918573e-05, %v2730_v31  ;;  %v1110_v30 = vsel %vm1109_vm5, %v1517_v3, %v1106_v10  ;;  %vm2778_vm8 = vmor %vm427_vm4, %vm428_vm2 }
 0x1f2   :  { %vm1112_vm6 = vcmp.eq.f32.partialorder %v1111_v52, 8.507059e+37  ;;  %v817_v39 = vadd.f32 0.112945676, %v816_v54  ;;  %v1162_v18 = vadd.f32 0.00028619796, %v1161_v16  ;;  %v2751_v2 = vadd.f32 %v2448_v48, %v546_v32 }
 0x1f3   :  { %v1115_v36 = vsel %vm1112_vm6, %v1114_v42, %v1110_v30  ;;  %v1173_v1 = vadd.f32 0.001143296, %v1172_v63  ;;  %v2748_v47 = vmul.f32 0.70710677, %v2737_v19  ;;  %v806_v38 = vadd.f32 0.05243302, %v805_v59 }
 0x1f4   :  { %v1116_v6 = vmul.f32 %v1115_v36, %v1091_v8  ;;  %v818_v27 = vmul.f32 %v817_v39, %v2692_v46  ;;  %v1163_v60 = vmul.f32 %v1162_v18, %v2730_v31  ;;  %v1519_v44 = vpop.eup %1518  ;;  %v1130_v62 = vadd.f32 1.1283791, %v1129_v11 }
 0x1f5   :  { %v1174_v3 = vmul.f32 %v1173_v1, %v2730_v31  ;;  %v839_v26 = vmul.f32 %v2748_v47, %v2748_v47  ;;  %v2759_v55 = vmul.f32 0.70710677, %v2751_v2  ;;  %v1143_v41 = vmul.f32 %v1519_v44, %v2728_v4 }
 0x1f6   :  { %v1420_v17 = vclamps-f32 %v1116_v6, 1.0  ;;  %v1151_v61 = vand.u32 2147483647, %v2728_v4  ;;  %v1153_v56 = vand.u32 2147483648, %v2728_v4  ;;  %v426_v24 = vmul.f32 %v2308_v20, %v425_v57 }
 0x1f7   :  { %v819_v22 = vadd.f32 0.4994258, %v818_v27  ;;  %v1164_v28 = vadd.f32 0.0036580483, %v1163_v60  ;;  %v1175_v34 = vadd.f32 0.014752088, %v1174_v3  ;;  %v807_v43 = vmul.f32 %v806_v38, %v2692_v46 }
 0x1f8   :  { %v1251_v23 = vadd.f32 1.0, %v1420_v17  ;;  %v1144_v45 = vsub.f32 1.0, %v1143_v41  ;;  %v2768_v58 = vmin.f32 %v839_v26, 16.0  ;;  %vm1148_vm7 = vweird.f32 %v1519_v44 }
 0x1f9   :  { %v820_v53 = vmul.f32 %v819_v22, %v2692_v46  ;;  %v1176_v7 = vmul.f32 %v1175_v34, %v2730_v31  ;;  %v1199_v29 = vmul.f32 %v2759_v55, %v2759_v55  ;;  %v1165_v9 = vmul.f32 %v1164_v28, %v2730_v31 }
 0x1fa   :  { %v1267_v57 = vmul.f32 %v1251_v23, %v2706_v50  ;;  %v1145_v40 = vmul.f32 %v1519_v44, %v1144_v45  ;;  %v841_v35 = vmul.f32 2.1237322e-06, %v2768_v58  ;;  %v430_v52 = vsel %vm2778_vm8, %v2308_v20, %v426_v24 }
 0x1fb   :  { %v1131_v51 = vmul.f32 %v1130_v62, %v2595_v25  ;;  %v2789_v32 = vadd.f32 1.0, %v820_v53  ;;  %v1177_v5 = vadd.f32 0.112945676, %v1176_v7  ;;  %vm1147_vm9 = vweird.f32 %v2728_v4 }
 0x1fc   :  { %1343 = vmatmul.f32.gmra.mxu3 %v1267_v57  ;;  %v1146_v10 = vadd.f32 %v1519_v44, %v1145_v40  ;;  %v808_v59 = vadd.f32 0.18741608, %v807_v43  ;;  %v852_v50 = vmul.f32 3.8918573e-05, %v2768_v58  ;;  %vm1149_vm10 = vmor %vm1147_vm9, %vm1148_vm7  ;;  %v1154_v54 = vor.u32 1.1754944e-38, %v1153_v56 }
 0x1fd   :  { %1520 = vrcp.f32 %v2789_v32  ;;  %v842_v16 = vadd.f32 0.00028619796, %v841_v35  ;;  %v2795_v8 = vmin.f32 %v1199_v29, 16.0  ;;  %vm1152_vm11 = vcmp.eq.f32.partialorder %v1151_v61, 8.507059e+37 }
 0x1fe   :  { %v1150_v20 = vsel %vm1149_vm10, %v1519_v44, %v1146_v10  ;;  %v1166_v25 = vadd.f32 0.05243302, %v1165_v9  ;;  %v1178_v42 = vmul.f32 %v1177_v5, %v2730_v31  ;;  %v853_v63 = vadd.f32 0.001143296, %v852_v50 }
 0x1ff   :  { %v1155_v11 = vsel %vm1152_vm11, %v1154_v54, %v1150_v20  ;;  %v2993_v4 = vsub.f32 %v1810_v15, %v2154_v13  ;;  %v809_v18 = vmul.f32 %v808_v59, %v2692_v46  ;;  %v843_v1 = vmul.f32 %v842_v16, %v2768_v58 }
 0x200   :  { %v1156_v39 = vmul.f32 %v1155_v11, %v1131_v51  ;;  %v1179_v36 = vadd.f32 0.4994258, %v1178_v42  ;;  %v854_v6 = vmul.f32 %v853_v63, %v2768_v58  ;;  %v1201_v38 = vmul.f32 2.1237322e-06, %v2795_v8 }
 0x201   :  { %v518_v30 = vmul.f32 %v430_v52, %v2993_v4  ;;  %v1212_v27 = vmul.f32 3.8918573e-05, %v2795_v8  ;;  %v1167_v44 = vmul.f32 %v1166_v25, %v2730_v31  ;;  %v580_v17 = vmul.f32 0.5, %v2571_v33 }
 0x202   :  { %v1421_v60 = vclamps-f32 %v1156_v39, 1.0  ;;  %v1180_v62 = vmul.f32 %v1179_v36, %v2730_v31  ;;  %v855_v15 = vadd.f32 0.014752088, %v854_v6  ;;  %v1202_v13 = vadd.f32 0.00028619796, %v1201_v38 }
 0x203   :  { %v1521_v3 = vpop.eup %1520  ;;  %v1213_v26 = vadd.f32 0.001143296, %v1212_v27  ;;  %v538_v46 = vmul.f32 %v2638_v0, %v518_v30  ;;  %v810_v61 = vadd.f32 1.1283791, %v809_v18  ;;  %v844_v22 = vadd.f32 0.0036580483, %v843_v1 }
 0x204   :  { %v1252_v41 = vadd.f32 1.0, %v1421_v60  ;;  %v823_v56 = vmul.f32 %v1521_v3, %v2789_v32  ;;  %v2811_v24 = vadd.f32 1.0, %v1180_v62  ;;  %v856_v28 = vmul.f32 %v855_v15, %v2768_v58 }
 0x205   :  { %v1203_v34 = vmul.f32 %v1202_v13, %v2795_v8  ;;  %v1168_v43 = vadd.f32 0.18741608, %v1167_v44  ;;  %v1214_v53 = vmul.f32 %v1213_v26, %v2795_v8  ;;  %v831_v0 = vand.u32 2147483647, %v2789_v32 }
 0x206   :  { %v1268_v23 = vmul.f32 %v1252_v41, %v580_v17  ;;  %v824_v45 = vsub.f32 1.0, %v823_v56  ;;  %v833_v33 = vand.u32 2147483648, %v2789_v32  ;;  %1522 = vrcp.f32 %v2811_v24 }
 0x207   :  { %v2820_v7 = vadd.f32 %v2448_v48, %v538_v46  ;;  %vm828_vm12 = vweird.f32 %v1521_v3  ;;  %v857_v14 = vadd.f32 0.112945676, %v856_v28  ;;  %v1204_v57 = vadd.f32 0.0036580483, %v1203_v34 }
 0x208   :  { %1346 = vmatmul.f32.gmra.mxu3 %v1268_v23  ;;  %v825_v29 = vmul.f32 %v1521_v3, %v824_v45  ;;  %v845_v40 = vmul.f32 %v844_v22, %v2768_v58  ;;  %v1215_v9 = vadd.f32 0.014752088, %v1214_v53  ;;  %vm827_vm13 = vweird.f32 %v2789_v32 }
 0x209   :  { %v1169_v52 = vmul.f32 %v1168_v43, %v2730_v31  ;;  %v858_v51 = vmul.f32 %v857_v14, %v2768_v58  ;;  %v811_v5 = vmul.f32 %v810_v61, %v2664_v49  ;;  %vm829_vm14 = vmor %vm827_vm13, %vm828_vm12  ;;  %v834_v48 = vor.u32 1.1754944e-38, %v833_v33 }
 0x20a   :  { %v826_v35 = vadd.f32 %v1521_v3, %v825_v29  ;;  %v1216_v10 = vmul.f32 %v1215_v9, %v2795_v8  ;;  %v2829_v59 = vmul.f32 0.70710677, %v2820_v7  ;;  %vm832_vm15 = vcmp.eq.f32.partialorder %v831_v0, 8.507059e+37 }
 0x20b   :  { %v859_v54 = vadd.f32 0.4994258, %v858_v51  ;;  %v1205_v16 = vmul.f32 %v1204_v57, %v2795_v8  ;;  %v846_v25 = vadd.f32 0.05243302, %v845_v40  ;;  %v572_v49 = vmul.f32 0.5, %v2650_v12 }
 0x20c   :  { %v830_v50 = vsel %vm829_vm14, %v1521_v3, %v826_v35  ;;  %v1523_v20 = vpop.eup %1522  ;;  %v1217_v31 = vadd.f32 0.112945676, %v1216_v10  ;;  %v879_v42 = vmul.f32 %v2829_v59, %v2829_v59  ;;  %v1170_v63 = vadd.f32 1.1283791, %v1169_v52 }
 0x20d   :  { %v835_v32 = vsel %vm832_vm15, %v834_v48, %v830_v50  ;;  %v1183_v4 = vmul.f32 %v1523_v20, %v2811_v24  ;;  %v1193_v30 = vand.u32 2147483648, %v2811_v24  ;;  %v860_v39 = vmul.f32 %v859_v54, %v2768_v58 }
 0x20e   :  { %v836_v11 = vmul.f32 %v835_v32, %v811_v5  ;;  %v1218_v18 = vmul.f32 %v1217_v31, %v2795_v8  ;;  %v2839_v36 = vmin.f32 %v879_v42, 16.0  ;;  %v1191_v38 = vand.u32 2147483647, %v2811_v24 }
 0x20f   :  { %v1184_v6 = vsub.f32 1.0, %v1183_v4  ;;  %v1206_v27 = vadd.f32 0.05243302, %v1205_v16  ;;  %vm1188_vm0 = vweird.f32 %v1523_v20  ;;  %v847_v12 = vmul.f32 %v846_v25, %v2768_v58 }
 0x210   :  { %v1413_v1 = vclamps-f32 %v836_v11, 1.0  ;;  %v861_v60 = vadd.f32 1.0, %v860_v39  ;;  %v1219_v44 = vadd.f32 0.4994258, %v1218_v18  ;;  %v881_v15 = vmul.f32 2.1237322e-06, %v2839_v36  ;;  %v1308_v39 = vpop.f32.mrf.mxu1 }
 0x211   :  { %v1185_v3 = vmul.f32 %v1523_v20, %v1184_v6  ;;  %v892_v13 = vmul.f32 3.8918573e-05, %v2839_v36  ;;  %vm1187_vm1 = vweird.f32 %v2811_v24  ;;  %v1194_v26 = vor.u32 1.1754944e-38, %v1193_v30  ;;  %v2868_v30 = vld [vmem:[%s2908_s6] ss:$0 sm:$0xff]  ;;  %s1655_s6 = smov [#allocation8]  }
 0x212   :  { %v1244_v62 = vadd.f32 1.0, %v1413_v1  ;;  %1524 = vrcp.f32 %v861_v60  ;;  %v1207_v41 = vmul.f32 %v1206_v27, %v2795_v8  ;;  %v1220_v61 = vmul.f32 %v1219_v44, %v2795_v8  ;;  %vm1189_vm2 = vmor %vm1187_vm1, %vm1188_vm0  ;;  %s1392_s24 = sshll.u32 %s1655_s6, 4  ;;  %s1393_s24 = int_to_ptr.vmem [resolvable:$true] %s1392_s24 }
 0x213   :  { %v1186_v17 = vadd.f32 %v1523_v20, %v1185_v3  ;;  %v848_v56 = vadd.f32 0.18741608, %v847_v12  ;;  %v882_v22 = vadd.f32 0.00028619796, %v881_v15  ;;  %v893_v28 = vadd.f32 0.001143296, %v892_v13 }
 0x214   :  { %v1260_v46 = vmul.f32 %v1244_v62, %v572_v49  ;;  %v1171_v34 = vmul.f32 %v1170_v63, %v2710_v37  ;;  %vm1192_vm3 = vcmp.eq.f32.partialorder %v1191_v38, 8.507059e+37  ;;  %v2850_v45 = vadd.f32 1.0, %v1220_v61  ;;  %v1532_v15 = vld [vmem:[#allocation2] sm:$0xff] }
 0x215   :  { %v1190_v23 = vsel %vm1189_vm2, %v1523_v20, %v1186_v17  ;;  %v883_v43 = vmul.f32 %v882_v22, %v2839_v36  ;;  %v894_v53 = vmul.f32 %v893_v28, %v2839_v36  ;;  %v1208_v33 = vadd.f32 0.18741608, %v1207_v41  ;;  %v1533_v28 = vld [vmem:[#allocation2 + $0x40] sm:$0xff] }
 0x216   :  { %1322 = vmatmul.f32.gmra.mxu1 %v1260_v46  ;;  %v1195_v24 = vsel %vm1192_vm3, %v1194_v26, %v1190_v23  ;;  %1526 = vrcp.f32 %v2850_v45  ;;  %v849_v14 = vmul.f32 %v848_v56, %v2768_v58  ;;  %v581_v35 = vmul.f32 0.5, %v2686_v21 }
 0x217   :  { %v1196_v0 = vmul.f32 %v1195_v24, %v1171_v34  ;;  %v884_v9 = vadd.f32 0.0036580483, %v883_v43  ;;  %v895_v37 = vadd.f32 0.014752088, %v894_v53  ;;  %v871_v52 = vand.u32 2147483647, %v861_v60 }
 0x218   :  { %v1525_v29 = vpop.eup %1524  ;;  %v1209_v48 = vmul.f32 %v1208_v33, %v2795_v8  ;;  %v850_v50 = vadd.f32 1.1283791, %v849_v14  ;;  %v873_v54 = vand.u32 2147483648, %v861_v60  ;;  %vm867_vm5 = vweird.f32 %v861_v60 }
 0x219   :  { %v1422_v57 = vclamps-f32 %v1196_v0, 1.0  ;;  %v863_v40 = vmul.f32 %v1525_v29, %v861_v60  ;;  %v896_v10 = vmul.f32 %v895_v37, %v2839_v36  ;;  %vm868_vm4 = vweird.f32 %v1525_v29 }
 0x21a   :  { %v885_v58 = vmul.f32 %v884_v9, %v2839_v36  ;;  %vm872_vm6 = vcmp.eq.f32.partialorder %v871_v52, 8.507059e+37  ;;  %v1210_v42 = vadd.f32 1.1283791, %v1209_v48  ;;  %v851_v49 = vmul.f32 %v850_v50, %v2748_v47  ;;  %vm869_vm7 = vmor %vm867_vm5, %vm868_vm4 }
 0x21b   :  { %v1253_v51 = vadd.f32 1.0, %v1422_v57  ;;  %v864_v5 = vsub.f32 1.0, %v863_v40  ;;  %v897_v25 = vadd.f32 0.112945676, %v896_v10  ;;  %v874_v11 = vor.u32 1.1754944e-38, %v873_v54 }
 0x21c   :  { %v1527_v16 = vpop.eup %1526  ;;  %v1231_v4 = vand.u32 2147483647, %v2850_v45  ;;  %v1233_v1 = vand.u32 2147483648, %v2850_v45  ;;  %v886_v6 = vadd.f32 0.05243302, %v885_v58  ;;  %v1309_v47 = vadd.f32 %v2868_v30, %v1308_v39 }
 0x21d   :  { %v1269_v20 = vmul.f32 %v1253_v51, %v581_v35  ;;  %v865_v32 = vmul.f32 %v1525_v29, %v864_v5  ;;  %v1223_v31 = vmul.f32 %v1527_v16, %v2850_v45  ;;  %v898_v8 = vmul.f32 %v897_v25, %v2839_v36 }
 0x21e   :  { %vm1228_vm8 = vweird.f32 %v1527_v16  ;;  %vm1227_vm9 = vweird.f32 %v2850_v45  ;;  %v1356_v13 = vadd.f32 %v1532_v15, %v1309_v47  ;;  %v1234_v17 = vor.u32 1.1754944e-38, %v1233_v1  ;;  %v1538_v47 = vld [vmem:[#allocation2 + $0x18] sm:$0xff]  ;;  %v1539_v15 = vld [vmem:[#allocation2 + $0x20] sm:$0xff] }
 0x21f   :  { %1349 = vmatmul.f32.gmra.mxu3 %v1269_v20  ;;  %v866_v21 = vadd.f32 %v1525_v29, %v865_v32  ;;  %v1224_v63 = vsub.f32 1.0, %v1223_v31  ;;  %v899_v38 = vadd.f32 0.4994258, %v898_v8  ;;  %vm1229_vm10 = vmor %vm1227_vm9, %vm1228_vm8  ;;  %v887_v41 = vmul.f32 %v886_v6, %v2839_v36  ;;  %v1534_v20 = vld [vmem:[#allocation2 + $0x48] sm:$0xff] }
 0x220   :  { %v1332_v62 = vpop.f32.mrf.mxu3  ;;  %v1211_v56 = vmul.f32 %v1210_v42, %v2759_v55  ;;  %vm1232_vm11 = vcmp.eq.f32.partialorder %v1231_v4, 8.507059e+37  ;;  %1372 = vst [vmem:[#allocation8] sm:$0xff] %v1356_v13  ;;  %v573_v23 = vmul.f32 0.5, %v2737_v19  ;;  %v1535_v31 = vld [vmem:[#allocation2 + $0x8] sm:$0xff]  ;;  %v574_v8 = vmul.f32 0.5, %v2820_v7  ;;  %v1536_v4 = vld [vmem:[#allocation2 + $0x10] sm:$0xff] }
 0x221   :  { %v870_v18 = vsel %vm869_vm7, %v1525_v29, %v866_v21  ;;  %v1225_v12 = vmul.f32 %v1527_v16, %v1224_v63  ;;  %v900_v44 = vmul.f32 %v899_v38, %v2839_v36  ;;  %v1333_v26 = vadd.f32 %v2868_v30, %v1332_v62  ;;  %v1537_v38 = vld [vmem:[#allocation2 + $0x50] sm:$0xff] }
 0x222   :  { %v875_v27 = vsel %vm872_vm6, %v874_v11, %v870_v18  ;;  %v888_v0 = vadd.f32 0.18741608, %v887_v41  ;;  %v582_v29 = vmul.f32 0.5, %v2751_v2 }
 0x223   :  { %v876_v60 = vmul.f32 %v875_v27, %v851_v49  ;;  %v1226_v3 = vadd.f32 %v1527_v16, %v1225_v12  ;;  %v901_v61 = vadd.f32 1.0, %v900_v44  ;;  %v1364_v34 = vadd.f32 %v1533_v28, %v1333_v26  ;;  %v1540_v26 = vld [vmem:[#allocation2 + $0x58] sm:$0xff] }
 0x224   :  { %v889_v57 = vmul.f32 %v888_v0, %v2839_v36 }
 0x225   :  { %v1414_v46 = vclamps-f32 %v876_v60, 1.0  ;;  %v1230_v22 = vsel %vm1229_vm10, %v1527_v16, %v1226_v3  ;;  %1528 = vrcp.f32 %v901_v61  ;;  %1380 = vst [vmem:[#allocation8 + $0x40] sm:$0xff] %v1364_v34  ;;  %v913_v35 = vand.u32 2147483648, %v901_v61  ;;  %v1542_v34 = vld [vmem:[#allocation2 + $0x68] sm:$0xff] }
 0x226   :  { %v1235_v24 = vsel %vm1232_vm11, %v1234_v17, %v1230_v22  ;;  %v890_v19 = vadd.f32 1.1283791, %v889_v57  ;;  %v911_v51 = vand.u32 2147483647, %v901_v61  ;;  %vm907_vm13 = vweird.f32 %v901_v61 }
 0x227   :  { %v1245_v45 = vadd.f32 1.0, %v1414_v46  ;;  %v1236_v43 = vmul.f32 %v1235_v24, %v1211_v56  ;;  %v914_v50 = vor.u32 1.1754944e-38, %v913_v35  ;;  %v1546_v35 = vld [vmem:[#allocation2 + $0x78] sm:$0xff] }
 0x228   :  { %v891_v2 = vmul.f32 %v890_v19, %v2829_v59  ;;  %vm912_vm15 = vcmp.eq.f32.partialorder %v911_v51, 8.507059e+37 }
 0x229   :  { %v1261_v53 = vmul.f32 %v1245_v45, %v573_v23  ;;  %v1423_v33 = vclamps-f32 %v1236_v43, 1.0  ;;  %v1543_v43 = vld [vmem:[#allocation2 + $0x28] sm:$0xff] }
 0x22b   :  { %1325 = vmatmul.f32.gmra.mxu1 %v1261_v53  ;;  %v1254_v14 = vadd.f32 1.0, %v1423_v33  ;;  %v1529_v55 = vpop.eup %1528 }
 0x22c   :  { %v903_v9 = vmul.f32 %v1529_v55, %v901_v61  ;;  %vm908_vm12 = vweird.f32 %v1529_v55  ;;  %v1541_v61 = vld [vmem:[#allocation2 + $0x60] sm:$0xff] }
 0x22d   :  { %v1270_v40 = vmul.f32 %v1254_v14, %v582_v29  ;;  %vm909_vm14 = vmor %vm907_vm13, %vm908_vm12  ;;  %v1544_v29 = vld [vmem:[#allocation2 + $0x70] sm:$0xff] }
 0x22e   :  { %v904_v37 = vsub.f32 1.0, %v903_v9 }
 0x22f   :  { %1352 = vmatmul.f32.gmra.mxu3 %v1270_v40  ;;  %v1545_v40 = vld [vmem:[#allocation2 + $0x30] sm:$0xff] }
 0x230   :  { %v905_v52 = vmul.f32 %v1529_v55, %v904_v37  ;;  %v1335_v5 = vpop.f32.mrf.mxu3 }
 0x231   :  { %v1336_v10 = vadd.f32 %v2868_v30, %v1335_v5 }
 0x232   :  { %v906_v48 = vadd.f32 %v1529_v55, %v905_v52  ;;  %v1311_v54 = vpop.f32.mrf.mxu1 }
 0x233   :  { %v1312_v16 = vadd.f32 %v2868_v30, %v1311_v54  ;;  %v1365_v32 = vadd.f32 %v1534_v20, %v1336_v10 }
 0x234   :  { %v910_v36 = vsel %vm909_vm14, %v1529_v55, %v906_v48  ;;  %v1547_v48 = vld [vmem:[#allocation2 + $0x38] sm:$0xff] }
 0x235   :  { %v915_v58 = vsel %vm912_vm15, %v914_v50, %v910_v36  ;;  %v1357_v21 = vadd.f32 %v1535_v31, %v1312_v16  ;;  %1381 = vst [vmem:[#allocation8 + $0x48] sm:$0xff] %v1365_v32 }
 0x236   :  { %v916_v25 = vmul.f32 %v915_v58, %v891_v2 }
 0x237   :  { %1373 = vst [vmem:[#allocation8 + $0x8] sm:$0xff] %v1357_v21 }
 0x238   :  { %v1415_v42 = vclamps-f32 %v916_v25, 1.0 }
 0x23a   :  { %v1246_v49 = vadd.f32 1.0, %v1415_v42 }
 0x23c   :  { %v1262_v59 = vmul.f32 %v1246_v49, %v574_v8 }
 0x23e   :  { %1328 = vmatmul.f32.gmra.mxu1 %v1262_v59 }
 0x240   :  { %v1314_v11 = vpop.f32.mrf.mxu1 }
 0x241   :  { %v1315_v63 = vadd.f32 %v2868_v30, %v1314_v11 }
 0x243   :  { %v1358_v39 = vadd.f32 %v1536_v4, %v1315_v63 }
 0x245   :  { %1374 = vst [vmem:[#allocation8 + $0x10] sm:$0xff] %v1358_v39 }
 0x253   :  { %v1338_v18 = vpop.f32.mrf.mxu3 }
 0x254   :  { %v1339_v1 = vadd.f32 %v2868_v30, %v1338_v18 }
 0x256   :  { %v1317_v6 = vpop.f32.mrf.mxu1  ;;  %v1366_v27 = vadd.f32 %v1537_v38, %v1339_v1 }
 0x257   :  { %v1318_v12 = vadd.f32 %v2868_v30, %v1317_v6 }
 0x258   :  { %1382 = vst [vmem:[#allocation8 + $0x50] sm:$0xff] %v1366_v27 }
 0x259   :  { %v1359_v7 = vadd.f32 %v1538_v47, %v1318_v12 }
 0x25b   :  { %1375 = vst [vmem:[#allocation8 + $0x18] sm:$0xff] %v1359_v7 }
 0x269   :  { %v1320_v60 = vpop.f32.mrf.mxu1 }
 0x26a   :  { %v1321_v44 = vadd.f32 %v2868_v30, %v1320_v60  ;;  %v1341_v62 = vpop.f32.mrf.mxu3 }
 0x26b   :  { %v1342_v3 = vadd.f32 %v2868_v30, %v1341_v62 }
 0x26c   :  { %v1360_v13 = vadd.f32 %v1539_v15, %v1321_v44 }
 0x26d   :  { %v1367_v46 = vadd.f32 %v1540_v26, %v1342_v3 }
 0x26e   :  { %1376 = vst [vmem:[#allocation8 + $0x20] sm:$0xff] %v1360_v13 }
 0x26f   :  { %1383 = vst [vmem:[#allocation8 + $0x58] sm:$0xff] %v1367_v46 }
 0x27f   :  { %v1344_v17 = vpop.f32.mrf.mxu3 }
 0x280   :  { %v1345_v41 = vadd.f32 %v2868_v30, %v1344_v17 }
 0x282   :  { %v1368_v56 = vadd.f32 %v1541_v61, %v1345_v41 }
 0x284   :  { %1384 = vst [vmem:[#allocation8 + $0x60] sm:$0xff] %v1368_v56 }
 0x28b   :  { %v1347_v22 = vpop.f32.mrf.mxu3 }
 0x28c   :  { %v1348_v28 = vadd.f32 %v2868_v30, %v1347_v22 }
 0x28e   :  { %v1369_v23 = vadd.f32 %v1542_v34, %v1348_v28 }
 0x290   :  { %1385 = vst [vmem:[#allocation8 + $0x68] sm:$0xff] %v1369_v23 }
 0x293   :  { %v1323_v45 = vpop.f32.mrf.mxu1 }
 0x294   :  { %v1324_v24 = vadd.f32 %v2868_v30, %v1323_v45 }
 0x296   :  { %v1361_v53 = vadd.f32 %v1543_v43, %v1324_v24 }
 0x298   :  { %1377 = vst [vmem:[#allocation8 + $0x28] sm:$0xff] %v1361_v53 }
 0x2a2   :  { %v1350_v0 = vpop.f32.mrf.mxu3 }
 0x2a3   :  { %v1351_v33 = vadd.f32 %v2868_v30, %v1350_v0 }
 0x2a5   :  { %v1370_v14 = vadd.f32 %v1544_v29, %v1351_v33 }
 0x2a7   :  { %1386 = vst [vmem:[#allocation8 + $0x70] sm:$0xff] %v1370_v14 }
 0x2a8   :  { %v1326_v55 = vpop.f32.mrf.mxu1 }
 0x2a9   :  { %v1327_v57 = vadd.f32 %v2868_v30, %v1326_v55 }
 0x2ab   :  { %v1362_v9 = vadd.f32 %v1545_v40, %v1327_v57 }
 0x2ad   :  { %1378 = vst [vmem:[#allocation8 + $0x30] sm:$0xff] %v1362_v9 }
 0x2b2   :  { %v1353_v37 = vpop.f32.mrf.mxu3 }
 0x2b3   :  { %v1354_v19 = vadd.f32 %v2868_v30, %v1353_v37 }
 0x2b5   :  { %v1371_v52 = vadd.f32 %v1546_v35, %v1354_v19 }
 0x2b7   :  { %1387 = vst [vmem:[#allocation8 + $0x78] sm:$0xff] %v1371_v52 }
 0x2bb   :  { %v1329_v51 = vpop.f32.mrf.mxu1 }
 0x2bc   :  { %v1330_v5 = vadd.f32 %v2868_v30, %v1329_v51 }
 0x2be   :  { %v1363_v10 = vadd.f32 %v1547_v48, %v1330_v5 }
 0x2c0   :  { %1379 = vst [vmem:[#allocation8 + $0x38] sm:$0xff] %v1363_v10 }
 0x2c1   :  { %1400 = dma.vmem_to_hbm [thread:$0]  %s1393_s24, 2048, %s1395_s27, [#allocation4], %s1651_s9, %s1651_s9, %s1652_s10  }
 0x2c2   :  { %1648 = dma.done.wait [#allocation4], 2048  }
 0x2c3   :  { %1649 = vsyncadd [#allocation4], 4294965248 }
 0x2c4   :  { %1405 = vsyncpa [#allocation3], 1 }
 0x2c5   :  { %1406 = vsyncpa [#allocation6], 1 }
 0x2c6   :  { %1407 = vsyncpa [#allocation4], 1 }

</bundles_post_ra>
